<compile_context>
chip_gen: v7x
topology: tpu7x:2x2x1
jax: 0.10.0
libtpu: 0.0.40
codegen_flags: <defaults>
</compile_context>

<pallas_src>
import functools

import jax
import jax.numpy as jnp
from jax.experimental import pallas as pl
from jax.experimental.pallas import tpu as pltpu


_MIB = 1024 * 1024


# ----------------------------- capability probes ---------------------------- #

def _vmem_cap_bytes():
    """Physical VMEM per TensorCore (128 MiB v5e/v6e, 64 MiB v7x)."""
    try:
        return int(pltpu.get_tpu_info().vmem_capacity_bytes)
    except Exception:
        return 64 * _MIB                       # conservative (v7x) fallback


_BUFFERED1_OK = None


def _probe_buffered_one():
    """pl.Buffered(1) halves resident-weight VMEM (no pointless double
    buffering of constant-index blocks); probe it on a tiny kernel so the
    script still runs cleanly on jax versions where it is unsupported."""
    try:
        def k(x_ref, w_ref, o_ref):
            o_ref[...] = x_ref[...] + w_ref[...]
        x = jnp.arange(8 * 128, dtype=jnp.float32).reshape(8, 128)
        w = jnp.full((8, 128), 2.0, jnp.float32)
        f = pl.pallas_call(
            k,
            out_shape=jax.ShapeDtypeStruct((8, 128), jnp.float32),
            grid=(1,),
            in_specs=[pl.BlockSpec((8, 128), lambda i: (0, 0)),
                      pl.BlockSpec((8, 128), lambda i: (0, 0),
                                   pipeline_mode=pl.Buffered(1))],
            out_specs=pl.BlockSpec((8, 128), lambda i: (0, 0)),
        )
        out = jax.block_until_ready(f(x, w))
        return bool(jnp.allclose(out, x + w))
    except Exception:
        return False


def _const_spec(block_shape):
    """BlockSpec for a grid-invariant (resident) operand."""
    global _BUFFERED1_OK
    if _BUFFERED1_OK is None:
        _BUFFERED1_OK = _probe_buffered_one()
    nd = len(block_shape)
    if _BUFFERED1_OK:
        return pl.BlockSpec(block_shape, lambda *_: (0,) * nd,
                            pipeline_mode=pl.Buffered(1))
    return pl.BlockSpec(block_shape, lambda *_: (0,) * nd)


def _compiler_params(dim_semantics, est_vmem_bytes):
    cap = _vmem_cap_bytes()
    limit = int(min(cap, max(est_vmem_bytes, 32 * _MIB)))
    return pltpu.CompilerParams(dimension_semantics=dim_semantics,
                                vmem_limit_bytes=limit)


# ----------------------------- Pallas kernels ------------------------------ #

def _attn_block_kernel(xq_ref, xkv_ref, wq_ref, bq_ref, wkv_ref, bkv_ref,
                       wo_ref, bo_ref, g_ref, be_ref, o_ref,
                       kv_scr, attn_scr, *, n_heads, scale, compute_dtype):
    """One (batch, q-tile): QKV proj + MHA + out-proj + residual + LN1.

    xq_ref:  (1, tq, D) query rows of x (f32)
    xkv_ref: (1, L,  D) full sequence (f32) -- only read when q-tile index==0
    kv_scr:  (L, 2D)   cached K|V projection for the current batch element
    attn_scr:(tq, D)   per-head attention outputs (head-contiguous columns)
    Weights are pre-cast to `compute_dtype` on the host; accumulation,
    softmax and LayerNorm statistics stay float32.
    """
    exact = jnp.dtype(compute_dtype) == jnp.dtype(jnp.float32)
    qi = pl.program_id(1)

    xq = xq_ref[0]                                    # (tq, D) f32
    tq, D = xq.shape
    dh = D // n_heads

    # --- K/V projection for the whole sequence, cached across q-tiles ------ #
    @pl.when(qi == 0)
    def _():
        xkv = xkv_ref[0].astype(compute_dtype)        # (L, D)
        kv = jnp.dot(xkv, wkv_ref[...],
                     preferred_element_type=jnp.float32) + bkv_ref[...]
        kv_scr[...] = kv.astype(compute_dtype)        # (L, 2D)

    # --- Q projection for this tile ---------------------------------------- #
    q = jnp.dot(xq.astype(compute_dtype), wq_ref[...],
                preferred_element_type=jnp.float32) + bq_ref[...]   # (tq, D)

    # --- per-head attention; heads statically unrolled (n_heads is small). - #
    # Each head's dataflow terminates in a scratch store (bounds live ranges);
    # the out-projection below is a single full-K matmul.
    for h in range(n_heads):
        lo = h * dh
        qh = q[:, lo:lo + dh].astype(compute_dtype)   # (tq, dh)
        kh = kv_scr[:, lo:lo + dh]                    # (L,  dh)
        vh = kv_scr[:, D + lo:D + lo + dh]            # (L,  dh)
        # scores = (qh @ kh^T) * scale  (no transposed copy of K)
        s = jax.lax.dot_general(qh, kh, (((1,), (1,)), ((), ())),
                                preferred_element_type=jnp.float32) * scale
        m = jnp.max(s, axis=-1, keepdims=True)
        p = jnp.exp(s - m)
        l = jnp.sum(p, axis=-1, keepdims=True)
        if exact:
            p = p / l                                  # PyTorch-parity path
        else:
            p = p * pl.reciprocal(l, approx=True)      # EUP slot, ~free
        oh = jnp.dot(p.astype(compute_dtype), vh,
                     preferred_element_type=jnp.float32)             # (tq, dh)
        attn_scr[:, lo:lo + dh] = oh.astype(compute_dtype)

    # --- single out-projection (full K=D contraction) + residual + LN1 ----- #
    attn = jnp.dot(attn_scr[...], wo_ref[...],
                   preferred_element_type=jnp.float32) + bo_ref[...]  # (tq, D)
    z = xq + attn
    mean = jnp.mean(z, axis=-1, keepdims=True)
    var = jnp.mean((z - mean) ** 2, axis=-1, keepdims=True)
    o_ref[0] = ((z - mean) * jax.lax.rsqrt(var + 1e-5)) * g_ref[...] + be_ref[...]


def _ffn_addln_kernel(x_ref, w1_ref, b1_ref, w2_ref, b2_ref, g_ref, be_ref,
                      o_ref, *, compute_dtype):
    """out = LayerNorm(x + conv2(relu(conv1(x)))); kernel_size=1 convs == matmuls."""
    x = x_ref[...]                                                   # (tm, D) f32
    h = jnp.dot(x.astype(compute_dtype), w1_ref[...],
                preferred_element_type=jnp.float32) + b1_ref[...]
    h = jnp.maximum(h, 0.0)
    y = jnp.dot(h.astype(compute_dtype), w2_ref[...],
                preferred_element_type=jnp.float32) + b2_ref[...]
    z = x + y
    mean = jnp.mean(z, axis=-1, keepdims=True)
    var = jnp.mean((z - mean) ** 2, axis=-1, keepdims=True)
    o_ref[...] = ((z - mean) * jax.lax.rsqrt(var + 1e-5)) * g_ref[...] + be_ref[...]


def _layernorm_kernel(x_ref, g_ref, b_ref, o_ref):
    x = x_ref[...]
    mean = jnp.mean(x, axis=-1, keepdims=True)
    var = jnp.mean((x - mean) ** 2, axis=-1, keepdims=True)
    o_ref[...] = ((x - mean) * jax.lax.rsqrt(var + 1e-5)) * g_ref[...] + b_ref[...]


# ------------------------------- tile choosers ------------------------------ #

_ROW_TILES = (1024, 512, 256, 128, 64, 32, 16, 8)


def _choose_row_tile(m, bytes_per_row, budget):
    """Largest row tile (multiple of 8, dividing m, fitting `budget`).
    Falls back to a full-array tile, or a cdiv grid (Pallas masks the partial
    edge block) so awkward M never forces a VMEM-OOM single tile."""
    for t in _ROW_TILES:
        if m % t == 0 and t * bytes_per_row <= budget:
            return t, m // t
    if m * bytes_per_row <= budget:
        return m, 1
    for t in _ROW_TILES:
        if t * bytes_per_row <= budget:
            return t, pl.cdiv(m, t)
    return 8, pl.cdiv(m, 8)


def _choose_q_tile(seq_len, per_row, fixed, budget):
    for t in _ROW_TILES:
        if seq_len % t == 0 and fixed + t * per_row <= budget:
            return t
    return seq_len


# ------------------------------ thin wrappers ------------------------------ #

def attention_block(x, p, n_heads, compute_dtype):
    B, L, D = x.shape
    dh = D // n_heads
    cdb = jnp.dtype(compute_dtype).itemsize
    cap = _vmem_cap_bytes()

    weight_bytes = (D * D + D * 2 * D + D * D) * cdb + (8 * D) * 4
    fixed = (2 * L * D * 4                 # x_kv block, double buffered
             + L * 2 * D * cdb             # kv scratch
             + weight_bytes)
    per_q_row = (4 * D * 4                 # x_q + out blocks, double buffered
                 + 3 * D * 4               # q projection temp
                 + D * cdb                 # attn scratch
                 + 3 * L * 4)              # scores / probs temporaries
    budget = min(cap, 128 * _MIB) - 6 * _MIB
    tq = _choose_q_tile(L, per_q_row, fixed, max(budget, fixed + 8 * per_q_row))
    n_q = max(L // tq, 1)
    est = fixed + tq * per_q_row + 6 * _MIB

    kern = functools.partial(_attn_block_kernel, n_heads=n_heads,
                             scale=1.0 / (dh ** 0.5),
                             compute_dtype=compute_dtype)
    return pl.pallas_call(
        kern,
        out_shape=jax.ShapeDtypeStruct((B, L, D), jnp.float32),
        grid=(B, n_q),
        in_specs=[
            pl.BlockSpec((1, tq, D), lambda b, q: (b, q, 0)),   # x (query rows)
            pl.BlockSpec((1, L, D), lambda b, q: (b, 0, 0)),    # x (K/V rows)
            _const_spec((D, D)),           # wq   (compute_dtype)
            _const_spec((1, D)),           # bq   (f32)
            _const_spec((D, 2 * D)),       # wkv  (compute_dtype)
            _const_spec((1, 2 * D)),       # bkv
            _const_spec((D, D)),           # wo
            _const_spec((1, D)),           # bo
            _const_spec((1, D)),           # gamma1
            _const_spec((1, D)),           # beta1
        ],
        out_specs=pl.BlockSpec((1, tq, D), lambda b, q: (b, q, 0)),
        scratch_shapes=[pltpu.VMEM((L, 2 * D), compute_dtype),   # cached K|V
                        pltpu.VMEM((tq, D), compute_dtype)],     # head outputs
        compiler_params=_compiler_params(("parallel", "arbitrary"), est),
    )(x, x, p["wq_c"], p["bq2"], p["wkv_c"], p["bkv2"],
      p["wo_c"], p["bo2"], p["g1_2"], p["be1_2"])


def ffn_add_layernorm(x2d, p, compute_dtype):
    M, D = x2d.shape
    d_ff = p["w1_c"].shape[1]
    cdb = jnp.dtype(compute_dtype).itemsize
    cap = _vmem_cap_bytes()

    weight_bytes = 2 * D * d_ff * cdb + (d_ff + 4 * D) * 4
    per_row = 4 * D * 4 + 3 * d_ff * 4 + d_ff * cdb + 4 * D
    budget = min(cap, 128 * _MIB) - weight_bytes - 4 * _MIB
    tm, n_tiles = _choose_row_tile(M, per_row, max(budget, 8 * per_row))
    est = weight_bytes + tm * per_row + 4 * _MIB

    kern = functools.partial(_ffn_addln_kernel, compute_dtype=compute_dtype)
    return pl.pallas_call(
        kern,
        out_shape=jax.ShapeDtypeStruct((M, D), jnp.float32),
        grid=(n_tiles,),
        in_specs=[
            pl.BlockSpec((tm, D), lambda i: (i, 0)),            # x tile
            _const_spec((D, d_ff)),        # w1 (compute_dtype)
            _const_spec((1, d_ff)),        # b1
            _const_spec((d_ff, D)),        # w2
            _const_spec((1, D)),           # b2
            _const_spec((1, D)),           # gamma2
            _const_spec((1, D)),           # beta2
        ],
        out_specs=pl.BlockSpec((tm, D), lambda i: (i, 0)),
        compiler_params=_compiler_params(("parallel",), est),
    )(x2d, p["w1_c"], p["b1_2"], p["w2_c"], p["b2_2"], p["g2_2"], p["be2_2"])


def layernorm(x2d, gamma, beta):
    M, D = x2d.shape
    cap = _vmem_cap_bytes()
    per_row = 6 * D * 4
    budget = min(cap, 128 * _MIB) - 4 * _MIB
    tm, n_tiles = _choose_row_tile(M, per_row, max(budget, 8 * per_row))
    est = tm * per_row + 4 * _MIB
    return pl.pallas_call(
        _layernorm_kernel,
        out_shape=jax.ShapeDtypeStruct((M, D), jnp.float32),
        grid=(n_tiles,),
        in_specs=[pl.BlockSpec((tm, D), lambda i: (i, 0)),
                  _const_spec((1, D)),
                  _const_spec((1, D))],
        out_specs=pl.BlockSpec((tm, D), lambda i: (i, 0)),
        compiler_params=_compiler_params(("parallel",), est),
    )(x2d, gamma.reshape(1, D), beta.reshape(1, D))


# --------------------------- Encoder forward pass -------------------------- #

def encoder_layer_forward(x, p, n_heads, compute_dtype):
    """One EncoderLayer: fused attention+LN1 kernel, fused FFN+LN2 kernel."""
    B, L, D = x.shape
    x1 = attention_block(x, p, n_heads, compute_dtype)
    x2 = ffn_add_layernorm(x1.reshape(B * L, D), p, compute_dtype)
    return x2.reshape(B, L, D), None       # output_attention=False -> None


def encoder_forward(x, layer_params, final_norm, n_heads,
                    compute_dtype=jnp.bfloat16):
    attns = []
    for p in layer_params:
        x, attn = encoder_layer_forward(x, p, n_heads, compute_dtype)
        attns.append(attn)
    B, L, D = x.shape
    x = layernorm(x.reshape(B * L, D), final_norm["g"], final_norm["b"])
    return x.reshape(B, L, D), attns


# ------------------------------ param helpers ------------------------------ #

def init_layer_params(key, d_model, d_ff):
    keys = jax.random.split(key, 6)
    s = 0.02
    return {
        "wq": jax.random.normal(keys[0], (d_model, d_model), jnp.float32) * s,
        "bq": jnp.zeros((d_model,), jnp.float32),
        "wk": jax.random.normal(keys[1], (d_model, d_model), jnp.float32) * s,
        "bk": jnp.zeros((d_model,), jnp.float32),
        "wv": jax.random.normal(keys[2], (d_model, d_model), jnp.float32) * s,
        "bv": jnp.zeros((d_model,), jnp.float32),
        "wo": jax.random.normal(keys[3], (d_model, d_model), jnp.float32) * s,
        "bo": jnp.zeros((d_model,), jnp.float32),
        "g1": jnp.ones((d_model,), jnp.float32),
        "be1": jnp.zeros((d_model,), jnp.float32),
        "w1": jax.random.normal(keys[4], (d_model, d_ff), jnp.float32) * s,
        "b1": jnp.zeros((d_ff,), jnp.float32),
        "w2": jax.random.normal(keys[5], (d_ff, d_model), jnp.float32) * s,
        "b2": jnp.zeros((d_model,), jnp.float32),
        "g2": jnp.ones((d_model,), jnp.float32),
        "be2": jnp.zeros((d_model,), jnp.float32),
    }


def prepare_layer_params(p, compute_dtype):
    """Host-side packing: pre-cast matmul weights to compute_dtype (biases,
    gammas stay f32 -- they are added to f32 accumulators), concat K|V, and
    reshape 1-D vectors to lane-dense (1, N)."""
    cd = compute_dtype
    d_model = p["wq"].shape[0]
    d_ff = p["w1"].shape[1]
    return {
        "wq_c": p["wq"].astype(cd),
        "wkv_c": jnp.concatenate([p["wk"], p["wv"]], axis=1).astype(cd),
        "wo_c": p["wo"].astype(cd),
        "w1_c": p["w1"].astype(cd),
        "w2_c": p["w2"].astype(cd),
        "bq2": p["bq"].reshape(1, d_model),
        "bkv2": jnp.concatenate([p["bk"], p["bv"]]).reshape(1, 2 * d_model),
        "bo2": p["bo"].reshape(1, d_model),
        "b1_2": p["b1"].reshape(1, d_ff),
        "b2_2": p["b2"].reshape(1, d_model),
        "g1_2": p["g1"].reshape(1, d_model),
        "be1_2": p["be1"].reshape(1, d_model),
        "g2_2": p["g2"].reshape(1, d_model),
        "be2_2": p["be2"].reshape(1, d_model),
    }


# ----------------------------------- main ----------------------------------- #

if __name__ == "__main__":
    B, L, D = 2, 8, 32
    n_heads = 4
    d_ff = 64
    num_layers = 2
    compute_dtype = jnp.bfloat16   # matmul operands; accum/softmax/LN stay f32

    root = jax.random.PRNGKey(0)
    k_x, *k_layers = jax.random.split(root, num_layers + 1)

    x = jax.random.normal(k_x, (B, L, D), dtype=jnp.float32)
    layer_params = [prepare_layer_params(init_layer_params(k, D, d_ff),
                                         compute_dtype)
                    for k in k_layers]
    final_norm = {"g": jnp.ones((D,), jnp.float32),
                  "b": jnp.zeros((D,), jnp.float32)}

    out, attns = encoder_forward(x, layer_params, final_norm, n_heads,
                                 compute_dtype=compute_dtype)
    out = jax.block_until_ready(out)

    assert out.shape == (B, L, D)
    assert bool(jnp.all(jnp.isfinite(out)))
    assert len(attns) == num_layers
    print("KERNEL_OK")
</pallas_src>

<mosaic_0001>
module attributes {stable_mosaic.version = 11 : i64} {
  func.func @k(%arg0: i32, %arg1: memref<8x128xf32, #tpu.memory_space<vmem>>, %arg2: memref<8x128xf32, #tpu.memory_space<vmem>>, %arg3: memref<8x128xf32, #tpu.memory_space<vmem>>) attributes {dimension_semantics = [#tpu.dimension_semantics<arbitrary>], iteration_bounds = array<i64: 1>, scalar_prefetch = 0 : i64, scratch_operands = 0 : i64, tpu.core_type = #tpu.core_type<tc>, window_params = [{pipeline_mode = #tpu.pipeline_mode<synchronous>, transform_indices = @transform_0, window_bounds = array<i64: 8, 128>}, {pipeline_mode = #tpu.pipeline_mode<synchronous>, transform_indices = @transform_1, window_bounds = array<i64: 8, 128>}, {pipeline_mode = #tpu.pipeline_mode<synchronous>, transform_indices = @transform_2, window_bounds = array<i64: 8, 128>}]} {
    %c0 = arith.constant 0 : index
    %c0_0 = arith.constant 0 : index
    %0 = vector.load %arg1[%c0, %c0_0] : memref<8x128xf32, #tpu.memory_space<vmem>>, vector<8x128xf32>
    %c0_1 = arith.constant 0 : index
    %c0_2 = arith.constant 0 : index
    %1 = vector.load %arg2[%c0_1, %c0_2] : memref<8x128xf32, #tpu.memory_space<vmem>>, vector<8x128xf32>
    %2 = arith.addf %0, %1 : vector<8x128xf32>
    %c0_3 = arith.constant 0 : index
    %c0_4 = arith.constant 0 : index
    %3 = vector.load %arg3[%c0_3, %c0_4] : memref<8x128xf32, #tpu.memory_space<vmem>>, vector<8x128xf32>
    tpu.vector_store %arg3[%c0_3, %c0_4], %2 {strides = array<i32>} : memref<8x128xf32, #tpu.memory_space<vmem>>, vector<8x128xf32>,
    return
  }
  func.func @transform_0(%arg0: i32) -> (i32, i32) {
    %c0_i32 = arith.constant 0 : i32
    %c0_i32_0 = arith.constant 0 : i32
    %c0_i32_1 = arith.constant 0 : i32
    return %c0_i32, %c0_i32_0 : i32, i32
  }
  func.func @transform_1(%arg0: i32) -> (i32, i32) {
    %c0_i32 = arith.constant 0 : i32
    %c0_i32_0 = arith.constant 0 : i32
    %c0_i32_1 = arith.constant 0 : i32
    return %c0_i32, %c0_i32_0 : i32, i32
  }
  func.func @transform_2(%arg0: i32) -> (i32, i32) {
    %c0_i32 = arith.constant 0 : i32
    %c0_i32_0 = arith.constant 0 : i32
    %c0_i32_1 = arith.constant 0 : i32
    return %c0_i32, %c0_i32_0 : i32, i32
  }
}

module attributes {stable_mosaic.version = 11 : i64} {
  func.func @_attn_block_kernel(%arg0: i32, %arg1: i32, %arg2: memref<1x8x32xf32, #tpu.memory_space<vmem>>, %arg3: memref<1x8x32xf32, #tpu.memory_space<vmem>>, %arg4: memref<32x32xbf16, #tpu.memory_space<vmem>>, %arg5: memref<1x32xf32, #tpu.memory_space<vmem>>, %arg6: memref<32x64xbf16, #tpu.memory_space<vmem>>, %arg7: memref<1x64xf32, #tpu.memory_space<vmem>>, %arg8: memref<32x32xbf16, #tpu.memory_space<vmem>>, %arg9: memref<1x32xf32, #tpu.memory_space<vmem>>, %arg10: memref<1x32xf32, #tpu.memory_space<vmem>>, %arg11: memref<1x32xf32, #tpu.memory_space<vmem>>, %arg12: memref<1x8x32xf32, #tpu.memory_space<vmem>>, %arg13: memref<8x64xbf16, #tpu.memory_space<vmem>>, %arg14: memref<8x32xbf16, #tpu.memory_space<vmem>>) attributes {dimension_semantics = [#tpu.dimension_semantics<parallel>, #tpu.dimension_semantics<arbitrary>], iteration_bounds = array<i64: 2, 1>, scalar_prefetch = 0 : i64, scratch_operands = 2 : i64, tpu.core_type = #tpu.core_type<tc>, window_params = [{transform_indices = @transform_0, window_bounds = array<i64: 1, 8, 32>}, {transform_indices = @transform_1, window_bounds = array<i64: 1, 8, 32>}, {pipeline_mode = #tpu.pipeline_mode<synchronous>, transform_indices = @transform_2, window_bounds = array<i64: 32, 32>}, {pipeline_mode = #tpu.pipeline_mode<synchronous>, transform_indices = @transform_3, window_bounds = array<i64: 1, 32>}, {pipeline_mode = #tpu.pipeline_mode<synchronous>, transform_indices = @transform_4, window_bounds = array<i64: 32, 64>}, {pipeline_mode = #tpu.pipeline_mode<synchronous>, transform_indices = @transform_5, window_bounds = array<i64: 1, 64>}, {pipeline_mode = #tpu.pipeline_mode<synchronous>, transform_indices = @transform_6, window_bounds = array<i64: 32, 32>}, {pipeline_mode = #tpu.pipeline_mode<synchronous>, transform_indices = @transform_7, window_bounds = array<i64: 1, 32>}, {pipeline_mode = #tpu.pipeline_mode<synchronous>, transform_indices = @transform_8, window_bounds = array<i64: 1, 32>}, {pipeline_mode = #tpu.pipeline_mode<synchronous>, transform_indices = @transform_9, window_bounds = array<i64: 1, 32>}, {transform_indices = @transform_10, window_bounds = array<i64: 1, 8, 32>}]} {
    %c0 = arith.constant 0 : index
    %c0_0 = arith.constant 0 : index
    %c0_1 = arith.constant 0 : index
    %0 = vector.load %arg2[%c0, %c0_0, %c0_1] : memref<1x8x32xf32, #tpu.memory_space<vmem>>, vector<1x8x32xf32>
    %1 = vector.shape_cast %0 : vector<1x8x32xf32> to vector<8x32xf32>
    %c0_i32 = arith.constant 0 : i32
    %2 = arith.cmpi eq, %arg1, %c0_i32 : i32
    %3 = arith.extui %2 : i1 to i32
    %c0_i32_2 = arith.constant 0 : i32
    %4 = arith.cmpi ne, %3, %c0_i32_2 : i32
    scf.if %4 {
      %c0_63 = arith.constant 0 : index
      %c0_64 = arith.constant 0 : index
      %c0_65 = arith.constant 0 : index
      %129 = vector.load %arg3[%c0_63, %c0_64, %c0_65] : memref<1x8x32xf32, #tpu.memory_space<vmem>>, vector<1x8x32xf32>
      %130 = vector.shape_cast %129 : vector<1x8x32xf32> to vector<8x32xf32>
      %131 = arith.truncf %130 : vector<8x32xf32> to vector<8x32xbf16>
      %c0_66 = arith.constant 0 : index
      %c0_67 = arith.constant 0 : index
      %132 = vector.load %arg6[%c0_66, %c0_67] : memref<32x64xbf16, #tpu.memory_space<vmem>>, vector<32x64xbf16>
      %cst_68 = arith.constant dense<0.000000e+00> : vector<8x64xf32>
      %133 = tpu.matmul %131, %132, %cst_68 {dimension_numbers = #tpu.dot_dimension_numbers<[1], [0], [0], [1], [0, 0, 1, 1], [], []>} : vector<8x32xbf16>, vector<32x64xbf16>, vector<8x64xf32> -> vector<8x64xf32>
      %c0_69 = arith.constant 0 : index
      %c0_70 = arith.constant 0 : index
      %134 = vector.load %arg7[%c0_69, %c0_70] : memref<1x64xf32, #tpu.memory_space<vmem>>, vector<1x64xf32>
      %135 = vector.broadcast %134 : vector<1x64xf32> to vector<8x64xf32>
      %136 = arith.addf %133, %135 : vector<8x64xf32>
      %137 = arith.truncf %136 : vector<8x64xf32> to vector<8x64xbf16>
      %c0_71 = arith.constant 0 : index
      %c0_72 = arith.constant 0 : index
      %138 = vector.load %arg13[%c0_71, %c0_72] : memref<8x64xbf16, #tpu.memory_space<vmem>>, vector<8x64xbf16>
      tpu.vector_store %arg13[%c0_71, %c0_72], %137 {strides = array<i32>} : memref<8x64xbf16, #tpu.memory_space<vmem>>, vector<8x64xbf16>,
    } else {
    }
    %5 = arith.truncf %1 : vector<8x32xf32> to vector<8x32xbf16>
    %c0_3 = arith.constant 0 : index
    %c0_4 = arith.constant 0 : index
    %6 = vector.load %arg4[%c0_3, %c0_4] : memref<32x32xbf16, #tpu.memory_space<vmem>>, vector<32x32xbf16>
    %cst = arith.constant dense<0.000000e+00> : vector<8x32xf32>
    %7 = tpu.matmul %5, %6, %cst {dimension_numbers = #tpu.dot_dimension_numbers<[1], [0], [0], [1], [0, 0, 1, 1], [], []>} : vector<8x32xbf16>, vector<32x32xbf16>, vector<8x32xf32> -> vector<8x32xf32>
    %c0_5 = arith.constant 0 : index
    %c0_6 = arith.constant 0 : index
    %8 = vector.load %arg5[%c0_5, %c0_6] : memref<1x32xf32, #tpu.memory_space<vmem>>, vector<1x32xf32>
    %9 = vector.broadcast %8 : vector<1x32xf32> to vector<8x32xf32>
    %10 = arith.addf %7, %9 : vector<8x32xf32>
    %11 = vector.extract_strided_slice %10 {offsets = [0, 0], sizes = [8, 8], strides = [1, 1]} : vector<8x32xf32> to vector<8x8xf32>
    %12 = arith.truncf %11 : vector<8x8xf32> to vector<8x8xbf16>
    %c0_7 = arith.constant 0 : index
    %c0_8 = arith.constant 0 : index
    %13 = vector.load %arg13[%c0_7, %c0_8] : memref<8x64xbf16, #tpu.memory_space<vmem>>, vector<8x8xbf16>
    %c0_9 = arith.constant 0 : index
    %c32 = arith.constant 32 : index
    %14 = vector.load %arg13[%c0_9, %c32] : memref<8x64xbf16, #tpu.memory_space<vmem>>, vector<8x8xbf16>
    %cst_10 = arith.constant dense<0.000000e+00> : vector<8x8xf32>
    %15 = tpu.matmul %12, %13, %cst_10 {dimension_numbers = #tpu.dot_dimension_numbers<[1], [1], [0], [0], [0, 0, 1, 0], [], []>} : vector<8x8xbf16>, vector<8x8xbf16>, vector<8x8xf32> -> vector<8x8xf32>
    %cst_11 = arith.constant 0.353553385 : f32
    %16 = vector.broadcast %cst_11 : f32 to vector<8x8xf32>
    %17 = arith.mulf %15, %16 : vector<8x8xf32>
    %cst_12 = arith.constant dense<0xFF800000> : vector<8xf32>
    %18 = vector.multi_reduction <maximumf>, %17, %cst_12 [1] : vector<8x8xf32> to vector<8xf32>
    %19 = vector.shape_cast %18 : vector<8xf32> to vector<8x1xf32>
    %20 = vector.broadcast %19 : vector<8x1xf32> to vector<8x8xf32>
    %21 = arith.subf %17, %20 : vector<8x8xf32>
    %22 = math.exp %21 : vector<8x8xf32>
    %cst_13 = arith.constant dense<0.000000e+00> : vector<8xf32>
    %23 = vector.multi_reduction <add>, %22, %cst_13 [1] : vector<8x8xf32> to vector<8xf32>
    %24 = vector.shape_cast %23 : vector<8xf32> to vector<8x1xf32>
    %25 = tpu.reciprocal %24 {approx = true} : vector<8x1xf32> -> vector<8x1xf32>
    %26 = vector.broadcast %25 : vector<8x1xf32> to vector<8x8xf32>
    %27 = arith.mulf %22, %26 : vector<8x8xf32>
    %28 = arith.truncf %27 : vector<8x8xf32> to vector<8x8xbf16>
    %cst_14 = arith.constant dense<0.000000e+00> : vector<8x8xf32>
    %29 = tpu.matmul %28, %14, %cst_14 {dimension_numbers = #tpu.dot_dimension_numbers<[1], [0], [0], [1], [0, 0, 1, 1], [], []>} : vector<8x8xbf16>, vector<8x8xbf16>, vector<8x8xf32> -> vector<8x8xf32>
    %30 = arith.truncf %29 : vector<8x8xf32> to vector<8x8xbf16>
    %c0_15 = arith.constant 0 : index
    %c0_16 = arith.constant 0 : index
    %31 = vector.load %arg14[%c0_15, %c0_16] : memref<8x32xbf16, #tpu.memory_space<vmem>>, vector<8x8xbf16>
    tpu.vector_store %arg14[%c0_15, %c0_16], %30 {strides = array<i32>} : memref<8x32xbf16, #tpu.memory_space<vmem>>, vector<8x8xbf16>,
    %32 = vector.extract_strided_slice %10 {offsets = [0, 8], sizes = [8, 8], strides = [1, 1]} : vector<8x32xf32> to vector<8x8xf32>
    %33 = arith.truncf %32 : vector<8x8xf32> to vector<8x8xbf16>
    %c0_17 = arith.constant 0 : index
    %c8 = arith.constant 8 : index
    %34 = vector.load %arg13[%c0_17, %c8] : memref<8x64xbf16, #tpu.memory_space<vmem>>, vector<8x8xbf16>
    %c0_18 = arith.constant 0 : index
    %c40 = arith.constant 40 : index
    %35 = vector.load %arg13[%c0_18, %c40] : memref<8x64xbf16, #tpu.memory_space<vmem>>, vector<8x8xbf16>
    %cst_19 = arith.constant dense<0.000000e+00> : vector<8x8xf32>
    %36 = tpu.matmul %33, %34, %cst_19 {dimension_numbers = #tpu.dot_dimension_numbers<[1], [1], [0], [0], [0, 0, 1, 0], [], []>} : vector<8x8xbf16>, vector<8x8xbf16>, vector<8x8xf32> -> vector<8x8xf32>
    %cst_20 = arith.constant 0.353553385 : f32
    %37 = vector.broadcast %cst_20 : f32 to vector<8x8xf32>
    %38 = arith.mulf %36, %37 : vector<8x8xf32>
    %cst_21 = arith.constant dense<0xFF800000> : vector<8xf32>
    %39 = vector.multi_reduction <maximumf>, %38, %cst_21 [1] : vector<8x8xf32> to vector<8xf32>
    %40 = vector.shape_cast %39 : vector<8xf32> to vector<8x1xf32>
    %41 = vector.broadcast %40 : vector<8x1xf32> to vector<8x8xf32>
    %42 = arith.subf %38, %41 : vector<8x8xf32>
    %43 = math.exp %42 : vector<8x8xf32>
    %cst_22 = arith.constant dense<0.000000e+00> : vector<8xf32>
    %44 = vector.multi_reduction <add>, %43, %cst_22 [1] : vector<8x8xf32> to vector<8xf32>
    %45 = vector.shape_cast %44 : vector<8xf32> to vector<8x1xf32>
    %46 = tpu.reciprocal %45 {approx = true} : vector<8x1xf32> -> vector<8x1xf32>
    %47 = vector.broadcast %46 : vector<8x1xf32> to vector<8x8xf32>
    %48 = arith.mulf %43, %47 : vector<8x8xf32>
    %49 = arith.truncf %48 : vector<8x8xf32> to vector<8x8xbf16>
    %cst_23 = arith.constant dense<0.000000e+00> : vector<8x8xf32>
    %50 = tpu.matmul %49, %35, %cst_23 {dimension_numbers = #tpu.dot_dimension_numbers<[1], [0], [0], [1], [0, 0, 1, 1], [], []>} : vector<8x8xbf16>, vector<8x8xbf16>, vector<8x8xf32> -> vector<8x8xf32>
    %51 = arith.truncf %50 : vector<8x8xf32> to vector<8x8xbf16>
    %c0_24 = arith.constant 0 : index
    %c8_25 = arith.constant 8 : index
    %52 = vector.load %arg14[%c0_24, %c8_25] : memref<8x32xbf16, #tpu.memory_space<vmem>>, vector<8x8xbf16>
    tpu.vector_store %arg14[%c0_24, %c8_25], %51 {strides = array<i32>} : memref<8x32xbf16, #tpu.memory_space<vmem>>, vector<8x8xbf16>,
    %53 = vector.extract_strided_slice %10 {offsets = [0, 16], sizes = [8, 8], strides = [1, 1]} : vector<8x32xf32> to vector<8x8xf32>
    %54 = arith.truncf %53 : vector<8x8xf32> to vector<8x8xbf16>
    %c0_26 = arith.constant 0 : index
    %c16 = arith.constant 16 : index
    %55 = vector.load %arg13[%c0_26, %c16] : memref<8x64xbf16, #tpu.memory_space<vmem>>, vector<8x8xbf16>
    %c0_27 = arith.constant 0 : index
    %c48 = arith.constant 48 : index
    %56 = vector.load %arg13[%c0_27, %c48] : memref<8x64xbf16, #tpu.memory_space<vmem>>, vector<8x8xbf16>
    %cst_28 = arith.constant dense<0.000000e+00> : vector<8x8xf32>
    %57 = tpu.matmul %54, %55, %cst_28 {dimension_numbers = #tpu.dot_dimension_numbers<[1], [1], [0], [0], [0, 0, 1, 0], [], []>} : vector<8x8xbf16>, vector<8x8xbf16>, vector<8x8xf32> -> vector<8x8xf32>
    %cst_29 = arith.constant 0.353553385 : f32
    %58 = vector.broadcast %cst_29 : f32 to vector<8x8xf32>
    %59 = arith.mulf %57, %58 : vector<8x8xf32>
    %cst_30 = arith.constant dense<0xFF800000> : vector<8xf32>
    %60 = vector.multi_reduction <maximumf>, %59, %cst_30 [1] : vector<8x8xf32> to vector<8xf32>
    %61 = vector.shape_cast %60 : vector<8xf32> to vector<8x1xf32>
    %62 = vector.broadcast %61 : vector<8x1xf32> to vector<8x8xf32>
    %63 = arith.subf %59, %62 : vector<8x8xf32>
    %64 = math.exp %63 : vector<8x8xf32>
    %cst_31 = arith.constant dense<0.000000e+00> : vector<8xf32>
    %65 = vector.multi_reduction <add>, %64, %cst_31 [1] : vector<8x8xf32> to vector<8xf32>
    %66 = vector.shape_cast %65 : vector<8xf32> to vector<8x1xf32>
    %67 = tpu.reciprocal %66 {approx = true} : vector<8x1xf32> -> vector<8x1xf32>
    %68 = vector.broadcast %67 : vector<8x1xf32> to vector<8x8xf32>
    %69 = arith.mulf %64, %68 : vector<8x8xf32>
    %70 = arith.truncf %69 : vector<8x8xf32> to vector<8x8xbf16>
    %cst_32 = arith.constant dense<0.000000e+00> : vector<8x8xf32>
    %71 = tpu.matmul %70, %56, %cst_32 {dimension_numbers = #tpu.dot_dimension_numbers<[1], [0], [0], [1], [0, 0, 1, 1], [], []>} : vector<8x8xbf16>, vector<8x8xbf16>, vector<8x8xf32> -> vector<8x8xf32>
    %72 = arith.truncf %71 : vector<8x8xf32> to vector<8x8xbf16>
    %c0_33 = arith.constant 0 : index
    %c16_34 = arith.constant 16 : index
    %73 = vector.load %arg14[%c0_33, %c16_34] : memref<8x32xbf16, #tpu.memory_space<vmem>>, vector<8x8xbf16>
    tpu.vector_store %arg14[%c0_33, %c16_34], %72 {strides = array<i32>} : memref<8x32xbf16, #tpu.memory_space<vmem>>, vector<8x8xbf16>,
    %74 = vector.extract_strided_slice %10 {offsets = [0, 24], sizes = [8, 8], strides = [1, 1]} : vector<8x32xf32> to vector<8x8xf32>
    %75 = arith.truncf %74 : vector<8x8xf32> to vector<8x8xbf16>
    %c0_35 = arith.constant 0 : index
    %c24 = arith.constant 24 : index
    %76 = vector.load %arg13[%c0_35, %c24] : memref<8x64xbf16, #tpu.memory_space<vmem>>, vector<8x8xbf16>
    %c0_36 = arith.constant 0 : index
    %c56 = arith.constant 56 : index
    %77 = vector.load %arg13[%c0_36, %c56] : memref<8x64xbf16, #tpu.memory_space<vmem>>, vector<8x8xbf16>
    %cst_37 = arith.constant dense<0.000000e+00> : vector<8x8xf32>
    %78 = tpu.matmul %75, %76, %cst_37 {dimension_numbers = #tpu.dot_dimension_numbers<[1], [1], [0], [0], [0, 0, 1, 0], [], []>} : vector<8x8xbf16>, vector<8x8xbf16>, vector<8x8xf32> -> vector<8x8xf32>
    %cst_38 = arith.constant 0.353553385 : f32
    %79 = vector.broadcast %cst_38 : f32 to vector<8x8xf32>
    %80 = arith.mulf %78, %79 : vector<8x8xf32>
    %cst_39 = arith.constant dense<0xFF800000> : vector<8xf32>
    %81 = vector.multi_reduction <maximumf>, %80, %cst_39 [1] : vector<8x8xf32> to vector<8xf32>
    %82 = vector.shape_cast %81 : vector<8xf32> to vector<8x1xf32>
    %83 = vector.broadcast %82 : vector<8x1xf32> to vector<8x8xf32>
    %84 = arith.subf %80, %83 : vector<8x8xf32>
    %85 = math.exp %84 : vector<8x8xf32>
    %cst_40 = arith.constant dense<0.000000e+00> : vector<8xf32>
    %86 = vector.multi_reduction <add>, %85, %cst_40 [1] : vector<8x8xf32> to vector<8xf32>
    %87 = vector.shape_cast %86 : vector<8xf32> to vector<8x1xf32>
    %88 = tpu.reciprocal %87 {approx = true} : vector<8x1xf32> -> vector<8x1xf32>
    %89 = vector.broadcast %88 : vector<8x1xf32> to vector<8x8xf32>
    %90 = arith.mulf %85, %89 : vector<8x8xf32>
    %91 = arith.truncf %90 : vector<8x8xf32> to vector<8x8xbf16>
    %cst_41 = arith.constant dense<0.000000e+00> : vector<8x8xf32>
    %92 = tpu.matmul %91, %77, %cst_41 {dimension_numbers = #tpu.dot_dimension_numbers<[1], [0], [0], [1], [0, 0, 1, 1], [], []>} : vector<8x8xbf16>, vector<8x8xbf16>, vector<8x8xf32> -> vector<8x8xf32>
    %93 = arith.truncf %92 : vector<8x8xf32> to vector<8x8xbf16>
    %c0_42 = arith.constant 0 : index
    %c24_43 = arith.constant 24 : index
    %94 = vector.load %arg14[%c0_42, %c24_43] : memref<8x32xbf16, #tpu.memory_space<vmem>>, vector<8x8xbf16>
    tpu.vector_store %arg14[%c0_42, %c24_43], %93 {strides = array<i32>} : memref<8x32xbf16, #tpu.memory_space<vmem>>, vector<8x8xbf16>,
    %c0_44 = arith.constant 0 : index
    %c0_45 = arith.constant 0 : index
    %95 = vector.load %arg14[%c0_44, %c0_45] : memref<8x32xbf16, #tpu.memory_space<vmem>>, vector<8x32xbf16>
    %c0_46 = arith.constant 0 : index
    %c0_47 = arith.constant 0 : index
    %96 = vector.load %arg8[%c0_46, %c0_47] : memref<32x32xbf16, #tpu.memory_space<vmem>>, vector<32x32xbf16>
    %cst_48 = arith.constant dense<0.000000e+00> : vector<8x32xf32>
    %97 = tpu.matmul %95, %96, %cst_48 {dimension_numbers = #tpu.dot_dimension_numbers<[1], [0], [0], [1], [0, 0, 1, 1], [], []>} : vector<8x32xbf16>, vector<32x32xbf16>, vector<8x32xf32> -> vector<8x32xf32>
    %c0_49 = arith.constant 0 : index
    %c0_50 = arith.constant 0 : index
    %98 = vector.load %arg9[%c0_49, %c0_50] : memref<1x32xf32, #tpu.memory_space<vmem>>, vector<1x32xf32>
    %99 = vector.broadcast %98 : vector<1x32xf32> to vector<8x32xf32>
    %100 = arith.addf %97, %99 : vector<8x32xf32>
    %101 = arith.addf %1, %100 : vector<8x32xf32>
    %cst_51 = arith.constant dense<0.000000e+00> : vector<8xf32>
    %102 = vector.multi_reduction <add>, %101, %cst_51 [1] : vector<8x32xf32> to vector<8xf32>
    %103 = vector.shape_cast %102 : vector<8xf32> to vector<8x1xf32>
    %cst_52 = arith.constant 3.200000e+01 : f32
    %104 = vector.broadcast %cst_52 : f32 to vector<8x1xf32>
    %105 = arith.divf %103, %104 : vector<8x1xf32>
    %106 = vector.broadcast %105 : vector<8x1xf32> to vector<8x32xf32>
    %107 = arith.subf %101, %106 : vector<8x32xf32>
    %108 = arith.mulf %107, %107 : vector<8x32xf32>
    %cst_53 = arith.constant dense<0.000000e+00> : vector<8xf32>
    %109 = vector.multi_reduction <add>, %108, %cst_53 [1] : vector<8x32xf32> to vector<8xf32>
    %110 = vector.shape_cast %109 : vector<8xf32> to vector<8x1xf32>
    %cst_54 = arith.constant 3.200000e+01 : f32
    %111 = vector.broadcast %cst_54 : f32 to vector<8x1xf32>
    %112 = arith.divf %110, %111 : vector<8x1xf32>
    %113 = vector.broadcast %105 : vector<8x1xf32> to vector<8x32xf32>
    %114 = arith.subf %101, %113 : vector<8x32xf32>
    %cst_55 = arith.constant 9.99999974E-6 : f32
    %115 = vector.broadcast %cst_55 : f32 to vector<8x1xf32>
    %116 = arith.addf %112, %115 : vector<8x1xf32>
    %117 = math.rsqrt %116 : vector<8x1xf32>
    %118 = vector.broadcast %117 : vector<8x1xf32> to vector<8x32xf32>
    %119 = arith.mulf %114, %118 : vector<8x32xf32>
    %c0_56 = arith.constant 0 : index
    %c0_57 = arith.constant 0 : index
    %120 = vector.load %arg10[%c0_56, %c0_57] : memref<1x32xf32, #tpu.memory_space<vmem>>, vector<1x32xf32>
    %121 = vector.broadcast %120 : vector<1x32xf32> to vector<8x32xf32>
    %122 = arith.mulf %119, %121 : vector<8x32xf32>
    %c0_58 = arith.constant 0 : index
    %c0_59 = arith.constant 0 : index
    %123 = vector.load %arg11[%c0_58, %c0_59] : memref<1x32xf32, #tpu.memory_space<vmem>>, vector<1x32xf32>
    %124 = vector.broadcast %123 : vector<1x32xf32> to vector<8x32xf32>
    %125 = arith.addf %122, %124 : vector<8x32xf32>
    %c0_60 = arith.constant 0 : index
    %c0_61 = arith.constant 0 : index
    %c0_62 = arith.constant 0 : index
    %126 = vector.load %arg12[%c0_60, %c0_61, %c0_62] : memref<1x8x32xf32, #tpu.memory_space<vmem>>, vector<1x8x32xf32>
    %127 = vector.shape_cast %126 : vector<1x8x32xf32> to vector<8x32xf32>
    %128 = vector.shape_cast %125 : vector<8x32xf32> to vector<1x8x32xf32>
    tpu.vector_store %arg12[%c0_60, %c0_61, %c0_62], %128 {strides = array<i32>} : memref<1x8x32xf32, #tpu.memory_space<vmem>>, vector<1x8x32xf32>,
    return
  }
  func.func @transform_0(%arg0: i32, %arg1: i32) -> (i32, i32, i32) {
    %c0_i32 = arith.constant 0 : i32
    %c0_i32_0 = arith.constant 0 : i32
    return %arg0, %arg1, %c0_i32 : i32, i32, i32
  }
  func.func @transform_1(%arg0: i32, %arg1: i32) -> (i32, i32, i32) {
    %c0_i32 = arith.constant 0 : i32
    %c0_i32_0 = arith.constant 0 : i32
    %c0_i32_1 = arith.constant 0 : i32
    return %arg0, %c0_i32, %c0_i32_0 : i32, i32, i32
  }
  func.func @transform_2(%arg0: i32, %arg1: i32) -> (i32, i32) {
    %c0_i32 = arith.constant 0 : i32
    %c0_i32_0 = arith.constant 0 : i32
    %c0_i32_1 = arith.constant 0 : i32
    return %c0_i32, %c0_i32_0 : i32, i32
  }
  func.func @transform_3(%arg0: i32, %arg1: i32) -> (i32, i32) {
    %c0_i32 = arith.constant 0 : i32
    %c0_i32_0 = arith.constant 0 : i32
    %c0_i32_1 = arith.constant 0 : i32
    return %c0_i32, %c0_i32_0 : i32, i32
  }
  func.func @transform_4(%arg0: i32, %arg1: i32) -> (i32, i32) {
    %c0_i32 = arith.constant 0 : i32
    %c0_i32_0 = arith.constant 0 : i32
    %c0_i32_1 = arith.constant 0 : i32
    return %c0_i32, %c0_i32_0 : i32, i32
  }
  func.func @transform_5(%arg0: i32, %arg1: i32) -> (i32, i32) {
    %c0_i32 = arith.constant 0 : i32
    %c0_i32_0 = arith.constant 0 : i32
    %c0_i32_1 = arith.constant 0 : i32
    return %c0_i32, %c0_i32_0 : i32, i32
  }
  func.func @transform_6(%arg0: i32, %arg1: i32) -> (i32, i32) {
    %c0_i32 = arith.constant 0 : i32
    %c0_i32_0 = arith.constant 0 : i32
    %c0_i32_1 = arith.constant 0 : i32
    return %c0_i32, %c0_i32_0 : i32, i32
  }
  func.func @transform_7(%arg0: i32, %arg1: i32) -> (i32, i32) {
    %c0_i32 = arith.constant 0 : i32
    %c0_i32_0 = arith.constant 0 : i32
    %c0_i32_1 = arith.constant 0 : i32
    return %c0_i32, %c0_i32_0 : i32, i32
  }
  func.func @transform_8(%arg0: i32, %arg1: i32) -> (i32, i32) {
    %c0_i32 = arith.constant 0 : i32
    %c0_i32_0 = arith.constant 0 : i32
    %c0_i32_1 = arith.constant 0 : i32
    return %c0_i32, %c0_i32_0 : i32, i32
  }
  func.func @transform_9(%arg0: i32, %arg1: i32) -> (i32, i32) {
    %c0_i32 = arith.constant 0 : i32
    %c0_i32_0 = arith.constant 0 : i32
    %c0_i32_1 = arith.constant 0 : i32
    return %c0_i32, %c0_i32_0 : i32, i32
  }
  func.func @transform_10(%arg0: i32, %arg1: i32) -> (i32, i32, i32) {
    %c0_i32 = arith.constant 0 : i32
    %c0_i32_0 = arith.constant 0 : i32
    return %arg0, %arg1, %c0_i32 : i32, i32, i32
  }
}

</mosaic_0001>

<bundles_post_ra>
// kernel: tpu_custom_call.1
= control target key start
LH: loop header
LB: loop body
LE: loop exit
PB: predicated region body
PF: predicated region fallthrough
CT: control target
= control target key end

     0   :  { %7 = vsyncpa [#allocation3], 0  ;;  %s185_s0 = inlined_call_operand.hbm [shape: f32[8,128], index: 0, kind: input, shape index: {}]   ;;  %s186_s1 = inlined_call_operand.hbm [shape: f32[8,128], index: 1, kind: input, shape index: {}]   ;;  %s187_s2 = inlined_call_operand.hbm [shape: f32[8,128], index: 2, kind: output, shape index: {}]  }
   0x1   :  { %8 = vsyncpa [#allocation6], 0 }
   0x2   :  { %9 = vsyncpa [#allocation4], 0  ;;  %s131_s9 = smov [#allocation2]   ;;  %s132_s11 = smov [#allocation5]  }
   0x3   :  { %s16_s10 = sshll.u32 %s131_s9, 4  ;;  %s26_s12 = sshll.u32 %s132_s11, 4  ;;  %s17_s10 = int_to_ptr.vmem [resolvable:$true] %s16_s10  ;;  %s27_s12 = int_to_ptr.vmem [resolvable:$true] %s26_s12 }
   0x4   :  { %s59_s15 = scalar_lea.hbm %s185_s0, 128 }
   0x5   :  { %p60_p0 = scmp.ne.s32.totalorder %s185_s0, %s59_s15  ;;  %p63_p1 = scmp.lt.u32.totalorder %s59_s15, %s185_s0 }
   0x7   :  { %p65_p2 = pnand %p63_p1, %p60_p0 }
   0x9   :  { %68 = shalt.err (!%p65_p2)
}
   0xa   :  { %s69_s20 = scalar_lea.vmem %s17_s10, 128  ;;  %p74_p4 = scmp.lt.s32.totalorder %s17_s10, %s17_s10 }
   0xb   :  { %p70_p3 = scmp.ne.s32.totalorder %s17_s10, %s69_s20  ;;  %p75_p5 = scmp.lt.s32.totalorder %s69_s20, %s69_s20 }
   0xd   :  { %p76_p6 = por %p75_p5, %p74_p4 }
   0xf   :  { %p77_p7 = pnand %p76_p6, %p70_p3 }
  0x11   :  { %80 = shalt.err (!%p77_p7)
}
  0x12   :  { %19 = dma.hbm_to_vmem [thread:$0]  %s185_s0, 128, %s17_s10, [#allocation3]  }
  0x13   :  { %s81_s25 = scalar_lea.hbm %s186_s1, 128 }
  0x14   :  { %p82_p8 = scmp.ne.s32.totalorder %s186_s1, %s81_s25  ;;  %p85_p9 = scmp.lt.u32.totalorder %s81_s25, %s186_s1 }
  0x16   :  { %p87_p10 = pnand %p85_p9, %p82_p8 }
  0x18   :  { %90 = shalt.err (!%p87_p10)
}
  0x19   :  { %s91_s30 = scalar_lea.vmem %s27_s12, 128  ;;  %p96_p12 = scmp.lt.s32.totalorder %s27_s12, %s27_s12 }
  0x1a   :  { %p92_p11 = scmp.ne.s32.totalorder %s27_s12, %s91_s30  ;;  %p97_p13 = scmp.lt.s32.totalorder %s91_s30, %s91_s30 }
  0x1c   :  { %p98_p0 = por %p97_p13, %p96_p12 }
  0x1e   :  { %p99_p1 = pnand %p98_p0, %p92_p11 }
  0x20   :  { %102 = shalt.err (!%p99_p1)
}
  0x21   :  { %29 = dma.hbm_to_vmem [thread:$0]  %s186_s1, 128, %s27_s12, [#allocation6]  }
  0x22   :  { %125 = dma.done.wait [#allocation3], 128  }
  0x23   :  { %126 = vsyncadd [#allocation3], 4294967168 }
  0x24   :  { %127 = dma.done.wait [#allocation6], 128  }
  0x25   :  { %128 = vsyncadd [#allocation6], 4294967168  ;;  %s133_s4 = smov [#allocation7]   ;;  %v36_v0 = vld [vmem:[#allocation2] sm:$0xff]  ;;  %v37_v1 = vld [vmem:[#allocation5] sm:$0xff] }
  0x26   :  { %s46_s5 = sshll.u32 %s133_s4, 4  ;;  %v38_v2 = vadd.f32 %v37_v1, %v36_v0  ;;  %s47_s5 = int_to_ptr.vmem [resolvable:$true] %s46_s5 }
  0x27   :  { %s103_s6 = scalar_lea.vmem %s47_s5, 128  ;;  %p108_p3 = scmp.lt.s32.totalorder %s47_s5, %s47_s5 }
  0x28   :  { %39 = vst [vmem:[#allocation7] sm:$0xff] %v38_v2  ;;  %p104_p2 = scmp.ne.s32.totalorder %s47_s5, %s103_s6  ;;  %p109_p4 = scmp.lt.s32.totalorder %s103_s6, %s103_s6 }
  0x2a   :  { %p110_p5 = por %p109_p4, %p108_p3 }
  0x2c   :  { %p111_p6 = pnand %p110_p5, %p104_p2 }
  0x2e   :  { %114 = shalt.err (!%p111_p6)
}
  0x2f   :  { %s115_s8 = scalar_lea.hbm %s187_s2, 128 }
  0x30   :  { %p116_p7 = scmp.ne.s32.totalorder %s187_s2, %s115_s8  ;;  %p119_p8 = scmp.lt.u32.totalorder %s115_s8, %s187_s2 }
  0x32   :  { %p121_p9 = pnand %p119_p8, %p116_p7 }
  0x34   :  { %124 = shalt.err (!%p121_p9)
}
  0x35   :  { %49 = dma.vmem_to_hbm [thread:$0]  %s47_s5, 128, %s187_s2, [#allocation4]  }
  0x36   :  { %129 = dma.done.wait [#allocation4], 128  }
  0x37   :  { %130 = vsyncadd [#allocation4], 4294967168 }
  0x38   :  { %53 = vsyncpa [#allocation3], 1 }
  0x39   :  { %54 = vsyncpa [#allocation6], 1 }
  0x3a   :  { %55 = vsyncpa [#allocation4], 1 }

// kernel: tpu_custom_call.1
= control target key start
LH: loop header
LB: loop body
LE: loop exit
PB: predicated region body
PF: predicated region fallthrough
CT: control target
= control target key end

     0   :  { %s2293_s0 = inlined_call_operand.hbm [shape: f32[2,8,32], index: 0, kind: input, shape index: {}]   ;;  %s2294_s1 = inlined_call_operand.hbm [shape: f32[2,8,32], index: 1, kind: input, shape index: {}]   ;;  %s2295_s2 = inlined_call_operand.hbm [shape: bf16[32,32], index: 2, kind: input, shape index: {}]   ;;  %s2296_s3 = inlined_call_operand.vmem [shape: f32[1,32], index: 3, kind: input, shape index: {}]   ;;  %s2297_s4 = inlined_call_operand.hbm [shape: bf16[32,64], index: 4, kind: input, shape index: {}]   ;;  %s2298_s5 = inlined_call_operand.vmem [shape: f32[1,64], index: 5, kind: input, shape index: {}]   ;;  %s2299_s6 = inlined_call_operand.vmem [shape: bf16[32,32], index: 6, kind: input, shape index: {}]   ;;  %s2300_s7 = inlined_call_operand.vmem [shape: f32[1,32], index: 7, kind: input, shape index: {}]   ;;  %s2301_s8 = inlined_call_operand.vmem [shape: f32[1,32], index: 8, kind: input, shape index: {}]   ;;  %s2302_s9 = inlined_call_operand.vmem [shape: f32[1,32], index: 9, kind: input, shape index: {}]   ;;  %s2303_s10 = inlined_call_operand.hbm [shape: f32[2,8,32], index: 10, kind: output, shape index: {}]  }
   0x1   :  { %2313 = sst [smem:[#allocation23_spill]] %s2295_s2 }
   0x2   :  { %2314 = sst [smem:[#allocation24_spill]] %s2297_s4 }
   0x3   :  { %2315 = sst [smem:[#allocation25_spill]] %s2302_s9 }
   0x4   :  { %2316 = sst [smem:[#allocation26_spill]] %s2303_s10 }
   0x5   :  { %15 = vsyncpa [#allocation5], 0 }
   0x6   :  { %17 = vsyncpa [#allocation5 + $0x1], 0 }
   0x7   :  { %18 = vsyncpa [#allocation8], 0 }
   0x8   :  { %20 = vsyncpa [#allocation8 + $0x1], 0 }
   0x9   :  { %21 = vsyncpa [#allocation11], 0 }
   0xa   :  { %22 = vsyncpa [#allocation6], 0 }
   0xb   :  { %24 = vsyncpa [#allocation6 + $0x1], 0  ;;  %s1895_s13 = smov 0   ;;  %s1897_s14 = smov 0  }
   0xc   :  { %s1899_s15 = smov 0   ;;  %s1901_s16 = smov 0  }
   0xd   :  { %s1903_s17 = smov 0   ;;  %s1905_s18 = smov 0  }
   0xe LB: > { %2317 = sst [smem:[#allocation18_spill]] %s1799_s13  ;;  %s1926_s19 = sadd.s32 4294967295, %s1819_s18   ;;  %s1819_s18 = sphi %s1905_s18, %s30_s18   ;;  %s1815_s17 = sphi %s1903_s17, %s2346_s17   ;;  %s1811_s16 = sphi %s1901_s16, %s2345_s16   ;;  %s1807_s15 = sphi %s1899_s15, %s2349_s15   ;;  %s1803_s14 = sphi %s1897_s14, %s2348_s14   ;;  %s1799_s13 = sphi %s1895_s13, %s2347_s13  }
   0xf   : > { %2318 = sst [smem:[#allocation19_spill]] %s1815_s17  ;;  %s1331_s20 = sadd.s32 4294967294, %s1819_s18  }
  0x10   : > { %p64_p0 = scmp.ne.s32.totalorder %s1803_s14, %s1799_s13  ;;  %p2305_p1 = scmp.eq.s32.totalorder %s1926_s19, 0 }
  0x11   : > { %p290_p3 = scmp.eq.s32.totalorder %s1331_s20, 1  ;;  %p1332_p5 = scmp.ge.s32.totalorder %s1819_s18, 1 }
  0x12   : > { %p1935_p4 = por %p2305_p1, %p64_p0  ;;  %p297_p7 = scmp.lt.s32.totalorder %s1819_s18, 3 }
  0x13   : > { %p1940_p6 = por %p290_p3, %p64_p0  ;;  %s1821_s24 = smov [#allocation9]  }
  0x14   : > { %s2319_s21 = scalar_select %p1935_p4, 1, 0 }
  0x15   : > { %s2320_s22 = scalar_select %p1940_p6, 1, 0 }
  0x16   : > { %p1945_p8 = pnand %p1332_p5, %p297_p7  ;;  %s309_s25 = sshll.u32 %s1821_s24, 4  ;;  %s1949_s25 = int_to_ptr.vmem [resolvable:$true] %s309_s25 }
  0x17   : > { %2321 = sst [smem:[#allocation20_spill]] %s2320_s22  ;;  %s1822_s27 = smov [#allocation10]  }
  0x18   : > { %s2322_s23 = scalar_select %p1945_p8, 1, 0 }
  0x19   : > { %p1493_p9 = pneg %p1945_p8  ;;  %s325_s28 = sshll.u32 %s1822_s27, 4  ;;  %s1960_s28 = int_to_ptr.vmem [resolvable:$true] %s325_s28 }
  0x1a   : > { %s2324_s2 = sld [smem:[#allocation23_spill]] }
  0x1b   : > { %p1956_p11 = pnand %p1493_p9, %p2305_p1 }
  0x1d   : > { %p1611_p13 = pneg %p1956_p11 }
  0x20   : > { %s1609_s11 = scalar_lea.hbm %s2324_s2, 256 }
  0x21   : > { %p1610_p12 = scmp.ne.s32.totalorder %s2324_s2, %s1609_s11  ;;  %p1616_p5 = scmp.lt.u32.totalorder %s1609_s11, %s2324_s2 }
  0x23   : > { %p1612_p0 = pnand %p1611_p13, %p1610_p12 }
  0x25   : > { %p1613_p3 = pneg %p1612_p0 }
  0x27   : > { %p1618_p7 = pnand %p1616_p5, %p1613_p3 }
  0x29   : > { %1621 = shalt.err (!%p1618_p7)
}
  0x2a   : > { %s1622_s27 = scalar_lea.vmem %s1949_s25, 256  ;;  %p1630_p2 = scmp.lt.s32.totalorder %s1949_s25, %s1949_s25 }
  0x2b   : > { %p1623_p9 = scmp.ne.s32.totalorder %s1949_s25, %s1622_s27  ;;  %p1631_p12 = scmp.lt.s32.totalorder %s1622_s27, %s1622_s27 }
  0x2d   : > { %p1625_p10 = pnand %p1623_p9, %p1611_p13  ;;  %p1632_p0 = por %p1631_p12, %p1630_p2 }
  0x2f   : > { %p1626_p1 = pneg %p1625_p10 }
  0x31   : > { %p1633_p6 = pnand %p1632_p0, %p1626_p1 }
  0x33   : > { %1636 = shalt.err (!%p1633_p6)
}
  0x34   : > { %s1823_s22 = smov 64   ;;  %s1824_s29 = smov 4  }
  0x35   : > { %1496 = dma.hbm_to_vmem [thread:$0]  (!%p1956_p11), %s2324_s2, 256, %s1949_s25, [#allocation8], %s1823_s22, %s1823_s22, %s1824_s29  }
  0x36   : > { %s2325_s4 = sld [smem:[#allocation24_spill]] }
  0x3c   : > { %s1637_s24 = scalar_lea.hbm %s2325_s4, 256 }
  0x3d   : > { %p1638_p2 = scmp.ne.s32.totalorder %s2325_s4, %s1637_s24  ;;  %p1644_p10 = scmp.lt.u32.totalorder %s1637_s24, %s2325_s4 }
  0x3f   : > { %p1640_p1 = pnand %p1638_p2, %p1611_p13 }
  0x41   : > { %p1641_p6 = pneg %p1640_p1 }
  0x43   : > { %p1646_p3 = pnand %p1644_p10, %p1641_p6 }
  0x45   : > { %1649 = shalt.err (!%p1646_p3)
}
  0x46   : > { %s1650_s25 = scalar_lea.vmem %s1960_s28, 256  ;;  %p1658_p12 = scmp.lt.s32.totalorder %s1960_s28, %s1960_s28 }
  0x47   : > { %p1651_p5 = scmp.ne.s32.totalorder %s1960_s28, %s1650_s25  ;;  %p1659_p0 = scmp.lt.s32.totalorder %s1650_s25, %s1650_s25 }
  0x49   : > { %p1653_p7 = pnand %p1651_p5, %p1611_p13  ;;  %p1660_p2 = por %p1659_p0, %p1658_p12 }
  0x4b   : > { %p1654_p9 = pneg %p1653_p7 }
  0x4d   : > { %p1661_p1 = pnand %p1660_p2, %p1654_p9 }
  0x4f   : > { %1664 = shalt.err (!%p1661_p1)
}
  0x50   : > { %1499 = dma.hbm_to_vmem [thread:$0]  (!%p1956_p11), %s2325_s4, 256, %s1960_s28, [#allocation11], %s1823_s22, %s1823_s22, %s1824_s29  }
  0x51   : > { %s42_s13 = sadd.s32 1, %s1815_s17  ;;  %s51_s30 = sadd.s32 1, %s1807_s15 }
  0x52   : > { %p44_p13 = scmp.ge.s32.totalorder %s42_s13, 2  ;;  %p58_p6 = scmp.ne.s32.totalorder %s1807_s15, %s1803_s14 }
  0x53   : > { %p59_p10 = scmp.eq.s32.totalorder %s1819_s18, 0  ;;  %p1513_p3 = scmp.lt.s32.totalorder %s1819_s18, 2 }
  0x54   : > { %s2351_s13 = smov (%p44_p13, %s42_s13), 0  ;;  %p2327_p7 = scmp.eq.s32.totalorder %s1926_s19, 1 }
  0x55   : > { %2326 = sst [smem:[#allocation21_spill]] %s2351_s13  ;;  %p60_p5 = por %p59_p10, %p58_p6 }
  0x56   : > { %p2024_p9 = por %p2327_p7, %p58_p6  ;;  %s46_s11 = ssub.s32 %s1815_s17, %s2351_s13 }
  0x57   : > { %s354_s12 = sand.u32 1, %s1807_s15   ;;  %p49_p12 = scmp.eq.s32.totalorder %s46_s11, 0 }
  0x58   : > { %s2328_s26 = scalar_select %p2024_p9, 1, 0 }
  0x59   : > { %s2031_s28 = sshll.u32 %s354_s12, 3  ;;  %s1337_s22 = sshll.u32 %s1815_s17, 7 }
  0x5a   : > { %s2035_s29 = scalar_select %p49_p12, %s1807_s15, %s51_s30  }
  0x5b   : > { %s2040_s27 = scalar_lea.hbm %s2293_s0, %s1337_s22  ;;  %s358_s25 = scalar_lea.vmem [#allocation4], %s2031_s28 }
  0x5c   : > { %2329 = sst [smem:[#allocation22_spill]] %s2035_s29  ;;  %s366_s9 = sshll.u32 %s358_s25, 4  ;;  %s2049_s9 = int_to_ptr.vmem [resolvable:$true] %s366_s9 }
  0x5d   : > { %p2045_p11 = pnand %p1513_p3, %p60_p5  ;;  %s2054_s20 = scalar_lea.hbm %s2294_s1, %s1337_s22 }
  0x5e   : > { %s355_s24 = scalar_lea.sflag [#allocation5], %s354_s12  ;;  %s1665_s2 = scalar_lea.hbm %s2040_s27, 128 }
  0x5f   : > { %p1666_p0 = scmp.ne.s32.totalorder %s2040_s27, %s1665_s2  ;;  %p1667_p2 = pneg %p2045_p11 }
  0x60   : > { %s1670_s13 = scalar_lea.hbm %s2293_s0, 256  ;;  %p1671_p6 = scmp.lt.u32.totalorder %s2040_s27, %s2293_s0 }
  0x61   : > { %p1668_p1 = pnand %p1667_p2, %p1666_p0  ;;  %p1672_p10 = scmp.lt.u32.totalorder %s1670_s13, %s1665_s2 }
  0x62   : > { %p1674_p5 = scmp.lt.u32.totalorder %s1665_s2, %s2040_s27 }
  0x63   : > { %p1669_p13 = pneg %p1668_p1  ;;  %p1673_p3 = por %p1672_p10, %p1671_p6 }
  0x65   : > { %p1675_p7 = por %p1674_p5, %p1673_p3 }
  0x67   : > { %p1676_p12 = pnand %p1675_p7, %p1669_p13 }
  0x69   : > { %1679 = shalt.err (!%p1676_p12)
}
  0x6a   : > { %s1680_s12 = scalar_lea.vmem %s2049_s9, 128  ;;  %s1825_s4 = smov [#allocation4]  }
  0x6b   : > { %p1681_p0 = scmp.ne.s32.totalorder %s2049_s9, %s1680_s12  ;;  %s1685_s22 = sshll.u32 %s1825_s4, 4  ;;  %s1686_s22 = int_to_ptr.vmem [resolvable:$false] %s1685_s22 }
  0x6c   : > { %s1687_s17 = scalar_lea.vmem %s1686_s22, 256  ;;  %p1688_p4 = scmp.lt.s32.totalorder %s2049_s9, %s1686_s22 }
  0x6d   : > { %p1683_p1 = pnand %p1681_p0, %p1667_p2  ;;  %p1689_p6 = scmp.lt.s32.totalorder %s1687_s17, %s1680_s12 }
  0x6f   : > { %p1684_p9 = pneg %p1683_p1  ;;  %p1690_p10 = por %p1689_p6, %p1688_p4 }
  0x71   : > { %p1691_p3 = pnand %p1690_p10, %p1684_p9 }
  0x73   : > { %1694 = shalt.err (!%p1691_p3)
}
  0x74   : > { %1503 = dma.hbm_to_vmem [thread:$0]  (!%p2045_p11), %s2040_s27, 128, %s2049_s9, %s355_s24  }
  0x75   : > { %s373_s2 = sand.u32 1, %s1819_s18   ;;  %s377_s13 = scalar_lea.vmem [#allocation7], %s2031_s28 }
  0x76   : > { %s384_s29 = sshll.u32 %s377_s13, 4  ;;  %s374_s30 = scalar_lea.sflag [#allocation8], %s373_s2  ;;  %s385_s29 = int_to_ptr.vmem [resolvable:$true] %s384_s29 }
  0x77   : > { %s1695_s11 = scalar_lea.hbm %s2054_s20, 128  ;;  %s1700_s4 = scalar_lea.hbm %s2294_s1, 256 }
  0x78   : > { %p1696_p4 = scmp.ne.s32.totalorder %s2054_s20, %s1695_s11  ;;  %p1701_p5 = scmp.lt.u32.totalorder %s2054_s20, %s2294_s1 }
  0x79   : > { %p1702_p7 = scmp.lt.u32.totalorder %s1700_s4, %s1695_s11  ;;  %p1704_p0 = scmp.lt.u32.totalorder %s1695_s11, %s2054_s20 }
  0x7a   : > { %p1698_p9 = pnand %p1696_p4, %p1667_p2 }
  0x7b   : > { %p1703_p12 = por %p1702_p7, %p1701_p5 }
  0x7c   : > { %p1699_p13 = pneg %p1698_p9 }
  0x7d   : > { %p1705_p1 = por %p1704_p0, %p1703_p12 }
  0x7f   : > { %p1706_p6 = pnand %p1705_p1, %p1699_p13 }
  0x81   : > { %1709 = shalt.err (!%p1706_p6)
}
  0x82   : > { %s1710_s28 = scalar_lea.vmem %s385_s29, 128  ;;  %s1826_s27 = smov [#allocation7]  }
  0x83   : > { %p1711_p10 = scmp.ne.s32.totalorder %s385_s29, %s1710_s28  ;;  %s1715_s9 = sshll.u32 %s1826_s27, 4  ;;  %s1716_s9 = int_to_ptr.vmem [resolvable:$false] %s1715_s9 }
  0x84   : > { %s1717_s24 = scalar_lea.vmem %s1716_s9, 256  ;;  %p1718_p9 = scmp.lt.s32.totalorder %s385_s29, %s1716_s9 }
  0x85   : > { %p1713_p3 = pnand %p1711_p10, %p1667_p2  ;;  %p1719_p8 = scmp.lt.s32.totalorder %s1717_s24, %s1710_s28 }
  0x87   : > { %p1714_p4 = pneg %p1713_p3  ;;  %p1720_p5 = por %p1719_p8, %p1718_p9 }
  0x89   : > { %p1721_p7 = pnand %p1720_p5, %p1714_p4 }
  0x8b   : > { %1724 = shalt.err (!%p1721_p7)
}
  0x8c   : > { %1506 = dma.hbm_to_vmem [thread:$0]  (!%p2045_p11), %s2054_s20, 128, %s385_s29, %s374_s30  }
  0x8d   : > { %p2331_p13 = scmp.ne.s32.totalorder %s2322_s23, 0 }
  0x8e   : > { %s2105_s2 = sand.u32 (!%p2331_p13), 1, %s1803_s14   ;;  %p2332_p8 = scmp.ne.s32.totalorder (!%p2331_p13), %s2319_s21, 0 }
  0x8f   : > { %393 = sbr.rel (%p2331_p13) target bundleno = 1955 (0x7a3), region = 60  ;;  %s2108_s13 = sshll.u32 (!%p2331_p13), %s2105_s2, 3 }
  0x90   : > { %s396_s11 = scalar_lea.sflag (!%p2331_p13), [#allocation5], %s2105_s2  ;;  %s399_s25 = scalar_lea.vmem (!%p2331_p13), [#allocation4], %s2108_s13 }
  0x96   : > { %1778 = dma.done.wait (%p2332_p8), %s396_s11, 128  }
  0x97   : > { %1780 = vsyncadd (%p2332_p8), %s396_s11, 4294967168  ;;  %s404_s23 = sand.u32 1, %s1926_s19   ;;  %s408_s20 = scalar_lea.vmem [#allocation7], %s2108_s13 }
  0x98   : > { %s405_s10 = scalar_lea.sflag [#allocation8], %s404_s23 }
  0x99   : > { %1782 = dma.done.wait (%p2332_p8), %s405_s10, 128  }
  0x9a   : > { %1784 = vsyncadd (%p2332_p8), %s405_s10, 4294967168  ;;  %p2333_p11 = scmp.eq.s32.totalorder %s1926_s19, 0 }
  0x9c   : > { %1786 = dma.done.wait (%p2333_p11), [#allocation8], 256   ;;  %p2334_p2 = pmov %p2333_p11 }
  0x9e   : > { %1788 = vsyncadd (%p2334_p2), [#allocation8], 4294967040  ;;  %p2335_p12 = pmov %p2334_p2 }
  0x9f   : > { %p2336_p0 = pmov %p2334_p2 }
  0xa0   : > { %1790 = dma.done.wait (%p2335_p12), [#allocation11], 256  }
  0xa1   : > { %1792 = vsyncadd (%p2336_p0), [#allocation11], 4294967040  ;;  %v1827_v0 = vmov 0.0   ;;  %vm1828_vm0 = vmmov 0   ;;  %v1581_v1 = vld [vmem:[#allocation10] sm:$0xff]   ;;  %v1582_v2 = vld [vmem:[#allocation10 + $0x8] sm:$0xff]  }
  0xa2   : > { %1407 = vmatprep.subr.bf16.mxu0 %v1827_v0  ;;  %1411 = vmatprep.mubr.msk.bf16.mxu0 %vm1828_vm0, %v1827_v0  ;;  %v464_v3 = vld [vmem:[%s408_s20] sm:$0xff]  ;;  %v1583_v4 = vld [vmem:[#allocation9] sm:$0xff]   ;;  %v1584_v5 = vld [vmem:[#allocation9 + $0x8] sm:$0xff]   ;;  %vm489_vm1 = vcmask 261120   ;;  %vm534_vm2 = vcmask 519168   ;;  %vm606_vm3 = vcmask 64512  }
  0xa3   : > { %1415 = vmatprep.subr.bf16.mxu1 %v1827_v0  ;;  %1419 = vmatprep.mubr.msk.bf16.mxu1 %vm1828_vm0, %v1827_v0  ;;  %v2137_v6 = vld [vmem:[%s399_s25] sm:$0xff]  ;;  %v465_v7 = vpack.c.bf16 %v464_v3, %v464_v3  ;;  %v1346_v9 = vld [vmem:[%s2298_s5] ss:$0 sm:$0xff]  ;;  %s1829_s12 = smov 112   ;;  %s1830_s4 = smov 120   ;;  %vm674_vm4 = vcmask 1043456  }
  0xa4   : > { %1408 = vmatpush3.bf16.msra.mxu0 %v1581_v1  ;;  %1416 = vmatpush3.bf16.msra.mxu1 %v1583_v4  ;;  %v536_v8 = vpack.c.bf16 %v2137_v6, %v2137_v6  ;;  %v1350_v20 = vld [vmem:[%s2296_s3] ss:$0 sm:$0xff]  ;;  %s1831_s22 = smov 104   ;;  %s1832_s17 = smov 96   ;;  %vm719_vm5 = vcmask 60416   ;;  %vm844_vm6 = vcmask 126016  }
  0xa5   : > { %1409 = vmatprep.subr.bf16.mxu0 %v1827_v0  ;;  %1417 = vmatprep.subr.bf16.mxu1 %v1827_v0  ;;  %s1833_s28 = smov 80   ;;  %s1834_s27 = smov 72   ;;  %vm968_vm7 = vcmask 191616   ;;  %vm1092_vm8 = vcmask 257216  }
  0xa6   : > { %s1835_s9 = smov 88   ;;  %s1836_s24 = smov 8  }
  0xa7   : > { %s1837_s20 = smov 16   ;;  %s1838_s19 = smov 24  }
  0xa8   : > { %1410 = vmatpush3.bf16.msra.mxu0 %v1582_v2  ;;  %1418 = vmatpush3.bf16.msra.mxu1 %v1584_v5  ;;  %s2338_s25 = sld [smem:[#allocation26_spill]]  ;;  %s1194_s10 = scalar_lea.sflag [#allocation6], %s2105_s2 }
  0xa9   : > { %1423 = vmatprep.subr.bf16.mxu0 %v1827_v0  ;;  %1429 = vmatprep.subr.bf16.mxu1 %v1827_v0  ;;  %p2339_p6 = scmp.ne.s32.totalorder %s2328_s26, 0 }
  0xab   : > { %1412 = vmatmul.mubr.msk.bf16.vlgmr.msra.gmra.mrb[0].mxu0 %vm489_vm1, %v465_v7  ;;  %1420 = vmatmul.mubr.msk.bf16.vlgmr.msra.gmra.mrb[0].mxu1 %vm489_vm1, %v536_v8 }
  0xac   : > { %1425 = vmatprep.mubr.msk.bf16.mxu0 %vm1828_vm0, %v1827_v0  ;;  %1431 = vmatprep.mubr.msk.bf16.mxu1 %vm1828_vm0, %v1827_v0 }
 0x17e   : > { %v527_v10 = vpop.f32.mrb[0].mxu0  ;;  %v598_v16 = vpop.f32.mrb[0].mxu1 }
 0x17f   : > { %v528_v11 = vadd.f32 %v1346_v9, %v527_v10  ;;  %v1413_v12 = vpop.f32.mrb[1].mxu0  ;;  %v1421_v17 = vpop.f32.mrb[1].mxu1  ;;  %v599_v21 = vadd.f32 %v1350_v20, %v598_v16 }
 0x180   : > { %v530_v13 = vpop.f32.mrb[2].mxu0  ;;  %v601_v18 = vpop.f32.mrb[2].mxu1 }
 0x181   : > { %v533_v14 = vpack.c.bf16 %v528_v11, %v528_v11  ;;  %v1414_v15 = vpop.f32.mrb[3].mxu0  ;;  %v1422_v19 = vpop.f32.mrb[3].mxu1  ;;  %v604_v26 = vpack.c.bf16 %v599_v21, %v599_v21 }
 0x183   : > { %535 = vst.msk [vmem:[#allocation2] sm:$0xf] %vm534_vm2, %v533_v14 }
 0x18a   : > { %v2156_v22 = vld [vmem:[#allocation2] sm:$0xf] }
 0x18b   : > { %v2158_v23 = vld [vmem:[#allocation2] ss:$0 sps:$4 sm:$0xff]   ;;  %v611_v24 = vsel %vm606_vm3, %v2156_v22, 0  ;;  %v1355_v3 = vcombine.low %v2156_v22, %v2156_v22 }
 0x18c   : > { %v2162_v25 = vld [vmem:[#allocation2] ss:$0 sps:$4 sm:$0xff]   ;;  %1424 = vmatpush3.bf16.xpose.msra.mxu0 %v611_v24  ;;  %852 = vrot.lane.b32.xlu1 %v2158_v23, %s1829_s12 }
 0x18d   : > { %728 = vrot.lane.b32.xlu0 %v2162_v25, %s1830_s4  ;;  %1435 = vmatprep.subr.bf16.mxu0 %v1827_v0  ;;  %v2168_v27 = vld [vmem:[#allocation2] ss:$0 sps:$4 sm:$0xff]  }
 0x190   : > { %847 = vrot.lane.b32.xlu1 %v604_v26, %s1829_s12 }
 0x191   : > { %723 = vrot.lane.b32.xlu0 %v604_v26, %s1830_s4 }
 0x193   : > { %1426 = vmatmul.mubr.msk.bf16.vlgmr.msra.gmra.mrb[4].mxu0 %vm606_vm3, %v604_v26 }
 0x194   : > { %971 = vrot.lane.b32.xlu1 %v604_v26, %s1831_s22  ;;  %1437 = vmatprep.mubr.msk.bf16.mxu0 %vm1828_vm0, %v1827_v0 }
 0x195   : > { %976 = vrot.lane.b32.xlu0 %v2168_v27, %s1831_s22 }
 0x1fe   : > { %v853_v30 = vpop.permute.xlu1 %852 }
 0x1ff   : > { %v729_v28 = vpop.permute.xlu0 %728  ;;  %v858_v32 = vsel %vm606_vm3, %v853_v30, 0 }
 0x200   : > { %v734_v29 = vsel %vm606_vm3, %v729_v28, 0 }
 0x201   : > { %1436 = vmatpush3.bf16.xpose.msra.mxu0 %v734_v29 }
 0x202   : > { %1447 = vmatprep.subr.bf16.mxu0 %v1827_v0  ;;  %v848_v34 = vpop.permute.xlu1 %847 }
 0x203   : > { %v724_v31 = vpop.permute.xlu0 %723 }
 0x206   : > { %v972_v36 = vpop.permute.xlu1 %971 }
 0x207   : > { %v977_v33 = vpop.permute.xlu0 %976 }
 0x208   : > { %1438 = vmatmul.mubr.msk.bf16.vlgmr.msra.gmra.mrb[8].mxu0 %vm606_vm3, %v724_v31  ;;  %v982_v35 = vsel %vm606_vm3, %v977_v33, 0 }
 0x209   : > { %1448 = vmatpush3.bf16.xpose.msra.mxu0 %v858_v32  ;;  %1449 = vmatprep.mubr.msk.bf16.mxu0 %vm1828_vm0, %v1827_v0 }
 0x20a   : > { %1459 = vmatprep.subr.bf16.mxu0 %v1827_v0 }
 0x210   : > { %1450 = vmatmul.mubr.msk.bf16.vlgmr.msra.gmra.mrb[12].mxu0 %vm606_vm3, %v848_v34 }
 0x211   : > { %1460 = vmatpush3.bf16.xpose.msra.mxu0 %v982_v35  ;;  %1461 = vmatprep.mubr.msk.bf16.mxu0 %vm1828_vm0, %v1827_v0 }
 0x212   : > { %1471 = vmatprep.subr.bf16.mxu0 %v1827_v0 }
 0x218   : > { %1462 = vmatmul.mubr.msk.bf16.vlgmr.msra.gmra.mrb[16].mxu0 %vm606_vm3, %v972_v36 }
 0x219   : > { %1475 = vmatprep.mubr.msk.bf16.mxu0 %vm1828_vm0, %v1827_v0 }
 0x266   : > { %v647_v37 = vpop.f32.mrb[4].mxu0 }
 0x267   : > { %v653_v38 = vmul.f32 0.35355338, %v647_v37  ;;  %v1427_v39 = vpop.f32.mrb[5].mxu0 }
 0x268   : > { %v650_v40 = vpop.f32.mrb[6].mxu0 }
 0x269   : > { %v1428_v41 = vpop.f32.mrb[7].mxu0  ;;  %v654_v42 = vsel %vm606_vm3, %v653_v38, -inf }
 0x26a   : > { %655 = vmax.xlane.f32.xlu0 %v654_v42 }
 0x2db   : > { %v770_v43 = vpop.f32.mrb[8].mxu0 }
 0x2dc   : > { %v776_v44 = vmul.f32 0.35355338, %v770_v43  ;;  %v1439_v45 = vpop.f32.mrb[9].mxu0 }
 0x2dd   : > { %v773_v46 = vpop.f32.mrb[10].mxu0 }
 0x2de   : > { %v1440_v47 = vpop.f32.mrb[11].mxu0  ;;  %v777_v48 = vsel %vm606_vm3, %v776_v44, -inf }
 0x2df   : > { %778 = vmax.xlane.f32.xlu1 %v777_v48 }
 0x2e3   : > { %v894_v49 = vpop.f32.mrb[12].mxu0 }
 0x2e4   : > { %v900_v50 = vmul.f32 0.35355338, %v894_v49  ;;  %v1451_v51 = vpop.f32.mrb[13].mxu0 }
 0x2e5   : > { %v897_v52 = vpop.f32.mrb[14].mxu0 }
 0x2e6   : > { %v1452_v53 = vpop.f32.mrb[15].mxu0  ;;  %v901_v54 = vsel %vm606_vm3, %v900_v50, -inf }
 0x2e7   : > { %902 = vmax.xlane.f32.xlu0 %v901_v54  ;;  %v1589_v54 = vld [vmem:[%s2299_s6] sm:$0xff]  }
 0x2e8   : > { %1472 = vmatpush3.bf16.msra.mxu0 %v1589_v54 }
 0x2e9   : > { %1473 = vmatprep.subr.bf16.mxu0 %v1827_v0 }
 0x2eb   : > { %v1018_v55 = vpop.f32.mrb[16].mxu0 }
 0x2ec   : > { %v1024_v56 = vmul.f32 0.35355338, %v1018_v55  ;;  %v1463_v57 = vpop.f32.mrb[17].mxu0 }
 0x2ed   : > { %v1021_v58 = vpop.f32.mrb[18].mxu0 }
 0x2ee   : > { %v1464_v59 = vpop.f32.mrb[19].mxu0  ;;  %v1025_v60 = vsel %vm606_vm3, %v1024_v56, -inf }
 0x2ef   : > { %1026 = vmax.xlane.f32.xlu0 %v1025_v60 }
 0x2f7   : > { %v656_v61 = vpop.xlane.xlu0 %655 }
 0x2f8   : > { %v657_v62 = vsub.f32 %v653_v38, %v656_v61 }
 0x2fa   : > { %v658_v63 = vmul.f32 1.442695, %v657_v62 }
 0x2fc   : > { %1591 = vpow2.f32 %v658_v63 }
 0x306   : > { %v1592_v1 = vpop.eup %1591 }
 0x307   : > { %v660_v2 = vsel %vm606_vm3, %v1592_v1, 0.0 }
 0x308   : > { %661 = vadd.xlane.f32.xlu1 %v660_v2 }
 0x319   : > { %669 = vrot.lane.b32.xlu1 %v1355_v3, %s1832_s17  ;;  %s2337_s17 = sld [smem:[#allocation25_spill]] }
 0x36c   : > { %v779_v4 = vpop.xlane.xlu1 %778 }
 0x36d   : > { %v780_v5 = vsub.f32 %v776_v44, %v779_v4 }
 0x36f   : > { %v781_v7 = vmul.f32 1.442695, %v780_v5 }
 0x371   : > { %1593 = vpow2.f32 %v781_v7  ;;  %v1369_v7 = vld [vmem:[%s2300_s7] ss:$0 sm:$0xff] }
 0x374   : > { %v903_v8 = vpop.xlane.xlu0 %902 }
 0x375   : > { %v904_v9 = vsub.f32 %v900_v50, %v903_v8 }
 0x377   : > { %v905_v10 = vmul.f32 1.442695, %v904_v9 }
 0x379   : > { %1595 = vpow2.f32 %v905_v10 }
 0x37b   : > { %v1594_v11 = vpop.eup %1593 }
 0x37c   : > { %v1027_v12 = vpop.xlane.xlu0 %1026  ;;  %v783_v13 = vsel %vm606_vm3, %v1594_v11, 0.0 }
 0x37d   : > { %v1028_v14 = vsub.f32 %v1024_v56, %v1027_v12  ;;  %784 = vadd.xlane.f32.xlu0 %v783_v13  ;;  %v1590_v56 = vld [vmem:[%s2299_s6 + $0x8] sm:$0xff]  }
 0x37e   : > { %1474 = vmatpush3.bf16.msra.mxu0 %v1590_v56 }
 0x37f   : > { %v1029_v15 = vmul.f32 1.442695, %v1028_v14 }
 0x381   : > { %1597 = vpow2.f32 %v1029_v15 }
 0x383   : > { %v1596_v16 = vpop.eup %1595 }
 0x384   : > { %v907_v17 = vsel %vm606_vm3, %v1596_v16, 0.0 }
 0x385   : > { %908 = vadd.xlane.f32.xlu1 %v907_v17 }
 0x38b   : > { %v1598_v18 = vpop.eup %1597 }
 0x38c   : > { %v1031_v19 = vsel %vm606_vm3, %v1598_v18, 0.0 }
 0x38d   : > { %1032 = vadd.xlane.f32.xlu0 %v1031_v19 }
 0x395   : > { %v662_v20 = vpop.xlane.xlu1 %661 }
 0x396   : > { %1599 = vrcp.f32 %v662_v20  ;;  %913 = vrot.lane.b32.xlu1 %v2158_v23, %s1833_s28  ;;  %s1376_s28 = sshll.u32 %s1811_s16, 7  ;;  %s1839_s16 = smov [#allocation12]  }
 0x397   : > { %s2243_s23 = scalar_lea.hbm %s2338_s25, %s1376_s28 }
 0x399   : > { %v670_v21 = vpop.permute.xlu1 %669 }
 0x39a   : > { %v676_v22 = vsel %vm674_vm4, %v670_v21, 0  ;;  %1037 = vrot.lane.b32.xlu1 %v2168_v27, %s1834_s27  ;;  %s457_s27 = scalar_lea.vmem [#allocation12], %s2108_s13  ;;  %s1729_s13 = sshll.u32 %s1839_s16, 4  ;;  %s1730_s13 = int_to_ptr.vmem [resolvable:$false] %s1729_s13 }
 0x39b   : > { %1430 = vmatpush3.bf16.msra.mxu1 %v676_v22 }
 0x39c   : > { %1441 = vmatprep.subr.bf16.mxu1 %v1827_v0 }
 0x3a0   : > { %v1600_v24 = vpop.eup %1599 }
 0x3a1   : > { %v664_v26 = vmul.f32 %v1600_v24, %v1592_v1 }
 0x3a3   : > { %789 = vrot.lane.b32.xlu0 %v2162_v25, %s1835_s9  ;;  %v665_v28 = vpack.c.bf16 %v664_v26, %v664_v26  ;;  %s1208_s9 = sshll.u32 %s457_s27, 4  ;;  %s2245_s9 = int_to_ptr.vmem [resolvable:$true] %s1208_s9 }
 0x3a4   : > { %p1732_p4 = scmp.lt.s32.totalorder %s2245_s9, %s1730_s13 }
 0x3a5   : > { %1432 = vmatmul.mubr.msk.bf16.vlgmr.msra.gmra.mrb[4].mxu1 %vm606_vm3, %v665_v28  ;;  %v1374_v28 = vld [vmem:[%s2337_s17] ss:$0 sm:$0xff] }
 0x3a6   : > { %1443 = vmatprep.mubr.msk.bf16.mxu1 %vm1828_vm0, %v1827_v0 }
 0x40a   : > { %v785_v23 = vpop.xlane.xlu0 %784 }
 0x40b   : > { %1601 = vrcp.f32 %v785_v23 }
 0x412   : > { %v909_v29 = vpop.xlane.xlu1 %908 }
 0x413   : > { %1603 = vrcp.f32 %v909_v29 }
 0x415   : > { %v1602_v30 = vpop.eup %1601 }
 0x416   : > { %v787_v31 = vmul.f32 %v1602_v30, %v1594_v11  ;;  %v914_v34 = vpop.permute.xlu1 %913 }
 0x417   : > { %v919_v36 = vsel %vm674_vm4, %v914_v34, 0 }
 0x418   : > { %v788_v25 = vpack.c.bf16 %v787_v31, %v787_v31 }
 0x41a   : > { %v1033_v27 = vpop.xlane.xlu0 %1032  ;;  %v1038_v38 = vpop.permute.xlu1 %1037 }
 0x41b   : > { %1605 = vrcp.f32 %v1033_v27  ;;  %v1043_v41 = vsel %vm674_vm4, %v1038_v38, 0 }
 0x41d   : > { %v1604_v35 = vpop.eup %1603 }
 0x41e   : > { %v790_v32 = vpop.permute.xlu0 %789  ;;  %v911_v37 = vmul.f32 %v1604_v35, %v1596_v16 }
 0x41f   : > { %v795_v33 = vsel %vm674_vm4, %v790_v32, 0 }
 0x420   : > { %1442 = vmatpush3.bf16.msra.mxu1 %v795_v33  ;;  %v912_v39 = vpack.c.bf16 %v911_v37, %v911_v37 }
 0x421   : > { %1453 = vmatprep.subr.bf16.mxu1 %v1827_v0 }
 0x423   : > { %1444 = vmatmul.mubr.msk.bf16.vlgmr.msra.gmra.mrb[8].mxu1 %vm606_vm3, %v788_v25 }
 0x424   : > { %1454 = vmatpush3.bf16.msra.mxu1 %v919_v36  ;;  %1455 = vmatprep.mubr.msk.bf16.mxu1 %vm1828_vm0, %v1827_v0 }
 0x425   : > { %1465 = vmatprep.subr.bf16.mxu1 %v1827_v0  ;;  %v1606_v40 = vpop.eup %1605 }
 0x426   : > { %v1035_v42 = vmul.f32 %v1606_v40, %v1598_v18 }
 0x428   : > { %v1036_v43 = vpack.c.bf16 %v1035_v42, %v1035_v42 }
 0x42b   : > { %1456 = vmatmul.mubr.msk.bf16.vlgmr.msra.gmra.mrb[12].mxu1 %vm606_vm3, %v912_v39 }
 0x42c   : > { %1466 = vmatpush3.bf16.msra.mxu1 %v1043_v41  ;;  %1467 = vmatprep.mubr.msk.bf16.mxu1 %vm1828_vm0, %v1827_v0 }
 0x433   : > { %1468 = vmatmul.mubr.msk.bf16.vlgmr.msra.gmra.mrb[16].mxu1 %vm606_vm3, %v1036_v43 }
 0x478   : > { %v712_v44 = vpop.f32.mrb[4].mxu1 }
 0x479   : > { %v718_v45 = vpack.c.bf16 %v712_v44, %v712_v44  ;;  %v1433_v46 = vpop.f32.mrb[5].mxu1 }
 0x47a   : > { %v715_v47 = vpop.f32.mrb[6].mxu1 }
 0x47b   : > { %720 = vst.msk [vmem:[#allocation3] sm:$0xf] %vm719_vm5, %v718_v45  ;;  %v1434_v48 = vpop.f32.mrb[7].mxu1 }
 0x4f6   : > { %v831_v49 = vpop.f32.mrb[8].mxu1 }
 0x4f7   : > { %v1379_v50 = vpack.c.bf16 %v831_v49, %v831_v49  ;;  %v1445_v51 = vpop.f32.mrb[9].mxu1 }
 0x4f8   : > { %v834_v52 = vpop.f32.mrb[10].mxu1 }
 0x4f9   : > { %841 = vrot.lane.b32.xlu0 %v1379_v50, %s1836_s24  ;;  %v1446_v53 = vpop.f32.mrb[11].mxu1 }
 0x4fe   : > { %v955_v55 = vpop.f32.mrb[12].mxu1 }
 0x4ff   : > { %v1380_v57 = vpack.c.bf16 %v955_v55, %v955_v55  ;;  %v1457_v58 = vpop.f32.mrb[13].mxu1 }
 0x500   : > { %v958_v59 = vpop.f32.mrb[14].mxu1 }
 0x501   : > { %965 = vrot.lane.b32.xlu1 %v1380_v57, %s1837_s20  ;;  %v1458_v60 = vpop.f32.mrb[15].mxu1  ;;  %s1725_s20 = scalar_lea.vmem %s2245_s9, 128 }
 0x502   : > { %p1726_p1 = scmp.ne.s32.totalorder %s2245_s9, %s1725_s20 }
 0x504   : > { %p1727_p10 = pnand %p1726_p1, %p2339_p6 }
 0x506   : > { %v1079_v61 = vpop.f32.mrb[16].mxu1  ;;  %p1728_p3 = pneg %p1727_p10 }
 0x507   : > { %v1381_v62 = vpack.c.bf16 %v1079_v61, %v1079_v61  ;;  %v1469_v63 = vpop.f32.mrb[17].mxu1 }
 0x508   : > { %v1082_v1 = vpop.f32.mrb[18].mxu1 }
 0x509   : > { %1089 = vrot.lane.b32.xlu0 %v1381_v62, %s1838_s19  ;;  %v1470_v2 = vpop.f32.mrb[19].mxu1  ;;  %s1731_s19 = scalar_lea.vmem %s1730_s13, 256 }
 0x50a   : > { %p1733_p9 = scmp.lt.s32.totalorder %s1731_s19, %s1725_s20 }
 0x50c   : > { %p1734_p5 = por %p1733_p9, %p1732_p4 }
 0x50e   : > { %p1735_p7 = pnand %p1734_p5, %p1728_p3 }
 0x56b   : > { %v842_v3 = vpop.permute.xlu0 %841 }
 0x56c   : > { %845 = vst.msk [vmem:[#allocation3] sm:$0xf] %vm844_vm6, %v842_v3 }
 0x573   : > { %v966_v4 = vpop.permute.xlu1 %965 }
 0x574   : > { %969 = vst.msk [vmem:[#allocation3] sm:$0xf] %vm968_vm7, %v966_v4 }
 0x57b   : > { %v1090_v0 = vpop.permute.xlu0 %1089 }
 0x57c   : > { %1093 = vst.msk [vmem:[#allocation3] sm:$0xf] %vm1092_vm8, %v1090_v0 }
 0x583   : > { %v1094_v5 = vld [vmem:[#allocation3] sm:$0xf] }
 0x584   : > { %1476 = vmatmul.mubr.msk.bf16.vlgmr.msra.gmra.mrb[20].mxu0 %vm489_vm1, %v1094_v5 }
 0x657   : > { %v1155_v8 = vpop.f32.mrb[20].mxu0 }
 0x658   : > { %v1156_v9 = vadd.f32 %v1369_v7, %v1155_v8  ;;  %v1477_v10 = vpop.f32.mrb[21].mxu0 }
 0x659   : > { %v1158_v11 = vpop.f32.mrb[22].mxu0 }
 0x65a   : > { %v1478_v12 = vpop.f32.mrb[23].mxu0  ;;  %v1161_v13 = vadd.f32 %v1156_v9, %v2137_v6  ;;  %v1373_v6 = vld [vmem:[%s2301_s8] ss:$0 sm:$0xff] }
 0x65c   : > { %v1162_v14 = vsel %vm489_vm1, %v1161_v13, 0.0 }
 0x65d   : > { %1163 = vadd.xlane.f32.xlu1 %v1162_v14 }
 0x6ea   : > { %v1164_v15 = vpop.xlane.xlu1 %1163 }
 0x6eb   : > { %v1166_v16 = vmul.f32 0.03125, %v1164_v15 }
 0x6ed   : > { %v1167_v17 = vsub.f32 %v1161_v13, %v1166_v16 }
 0x6ef   : > { %v1168_v18 = vmul.f32 %v1167_v17, %v1167_v17 }
 0x6f1   : > { %v1169_v19 = vsel %vm489_vm1, %v1168_v18, 0.0 }
 0x6f2   : > { %1170 = vadd.xlane.f32.xlu0 %v1169_v19 }
 0x77f   : > { %v1171_v20 = vpop.xlane.xlu0 %1170 }
 0x780   : > { %v1172_v21 = vmul.f32 0.03125, %v1171_v20 }
 0x782   : > { %v1173_v22 = vadd.f32 1e-05, %v1172_v21 }
 0x784   : > { %1607 = vrsqrt.f32 %v1173_v22 }
 0x78e   : > { %v1608_v24 = vpop.eup %1607 }
 0x78f   : > { %v1175_v26 = vmul.f32 %v1608_v24, %v1167_v17 }
 0x791   : > { %v1183_v23 = vmul.f32 %v1373_v6, %v1175_v26 }
 0x793   : > { %v1191_v29 = vadd.f32 %v1374_v28, %v1183_v23 }
 0x795   : > { %1192 = vst.msk [vmem:[%s457_s27] sm:$0xff] %vm489_vm1, %v1191_v29 }
 0x796   : > { %1738 = shalt.err (!%p1735_p7)
}
 0x797   : > { %s1739_s2 = scalar_lea.hbm %s2243_s23, 128  ;;  %s1743_s30 = scalar_lea.hbm %s2338_s25, 256 }
 0x798   : > { %p1740_p13 = scmp.ne.s32.totalorder %s2243_s23, %s1739_s2  ;;  %p1744_p2 = scmp.lt.u32.totalorder %s2243_s23, %s2338_s25 }
 0x799   : > { %p1745_p12 = scmp.lt.u32.totalorder %s1743_s30, %s1739_s2  ;;  %p1747_p1 = scmp.lt.u32.totalorder %s1739_s2, %s2243_s23 }
 0x79a   : > { %p1741_p8 = pnand %p1740_p13, %p2339_p6 }
 0x79b   : > { %p1746_p0 = por %p1745_p12, %p1744_p2 }
 0x79c   : > { %p1742_p11 = pneg %p1741_p8 }
 0x79d   : > { %p1748_p10 = por %p1747_p1, %p1746_p0 }
 0x79f   : > { %p1749_p3 = pnand %p1748_p10, %p1742_p11 }
 0x7a1   : > { %1752 = shalt.err (!%p1749_p3)
}
 0x7a2   : > { %1491 = dma.vmem_to_hbm [thread:$0]  (%p2339_p6), %s2245_s9, 128, %s2243_s23, %s1194_s10  }
 0x7a3 PF: > { %s2340_s22 = sld [smem:[#allocation18_spill]]  ;;  %s2341_s17 = sld [smem:[#allocation20_spill]] }
 0x7a4   : > { %p2343_p9 = scmp.ge.s32.totalorder %s1819_s18, 2 }
 0x7a9   : > { %s1220_s28 = sand.u32 1, %s2340_s22   ;;  %p2342_p4 = scmp.ne.s32.totalorder %s2341_s17, 0 }
 0x7aa   : > { %s1221_s27 = scalar_lea.sflag [#allocation6], %s1220_s28 }
 0x7ab   : > { %p1508_p5 = pnand %p2343_p9, %p2342_p4 }
 0x7ad   : > { %1794 = dma.done.wait (!%p1508_p5), %s1221_s27, 128  }
 0x7ae   : > { %1796 = vsyncadd (!%p1508_p5), %s1221_s27, 4294967168  ;;  %s30_s18 = sadd.s32 1, %s1819_s18   ;;  %s2344_s26 = sld [smem:[#allocation22_spill]] }
 0x7af   : > { %p27_p7 = scmp.ge.s32.totalorder %s30_s18, 4   ;;  %s2345_s16 = sld [smem:[#allocation19_spill]] }
 0x7b0   : > { %s2346_s17 = sld [smem:[#allocation21_spill]]  ;;  %s2347_s13 = smov %s1803_s14 }
 0x7b1   : > { %s2348_s14 = smov %s1807_s15  ;;  %29 = sbr.rel (!%p27_p7) target bundleno = 14 (0xe), region = 130 }
 0x7b4   : > { %s2349_s15 = smov %s2344_s26 }
 0x7b8   :  { %1226 = vsyncpa [#allocation5], 1 }
 0x7b9   :  { %1228 = vsyncpa [#allocation5 + $0x1], 1 }
 0x7ba   :  { %1229 = vsyncpa [#allocation8], 1 }
 0x7bb   :  { %1231 = vsyncpa [#allocation8 + $0x1], 1 }
 0x7bc   :  { %1232 = vsyncpa [#allocation11], 1 }
 0x7bd   :  { %1233 = vsyncpa [#allocation6], 1 }
 0x7be   :  { %1235 = vsyncpa [#allocation6 + $0x1], 1 }

</bundles_post_ra>
